<compile_context>
chip_gen: v7x
topology: tpu7x:2x2x1
jax: 0.10.0
libtpu: 0.0.40
codegen_flags: <defaults>
</compile_context>

<pallas_src>
import math

import jax
import jax.numpy as jnp
from jax.experimental import pallas as pl
from jax.experimental.pallas import tpu as pltpu


def _round_up(x: int, m: int) -> int:
    return ((x + m - 1) // m) * m


def _lora_kernel(x_ref, w_ref, bias_ref, a_ref, b_ref, o_ref, acc_ref, xa_ref):
    """Computes one (tm, tn) output tile; grid axis 2 (K) is the reduction."""
    k = pl.program_id(2)

    @pl.when(k == 0)
    def _init():
        acc_ref[...] = jnp.zeros_like(acc_ref)
        xa_ref[...] = jnp.zeros_like(xa_ref)

    x = x_ref[...]
    # Base linear partial product: x_tile @ W_tile (MXU, f32 accumulation).
    acc_ref[...] += jnp.dot(x, w_ref[...], preferred_element_type=jnp.float32)
    # Fused LoRA "down" projection: x_tile @ A_all_tile (all splits at once).
    xa_ref[...] += jnp.dot(x, a_ref[...], preferred_element_type=jnp.float32)

    @pl.when(k == pl.num_programs(2) - 1)
    def _finalize():
        # LoRA "up" projection against the alpha-scaled block-diagonal B_full
        # slab for this N tile; each split's columns land directly in place.
        lora = jnp.dot(xa_ref[...], b_ref[...].astype(jnp.float32),
                       preferred_element_type=jnp.float32)
        out = acc_ref[...] + lora + bias_ref[...].astype(jnp.float32)
        o_ref[...] = out.astype(o_ref.dtype)


def lora_forward(x, w_t, bias, A, B, *, alpha, tm=128, tn=256, tk=256,
                 compute_dtype=jnp.bfloat16):
    """x: (batch, seq, in_f); w_t: (in_f, out_f) (nn.Linear weight, transposed);
    bias: (out_f,); A: (split, in_f, rank); B: (split, rank, out_f // split)."""
    batch, seq, in_f = x.shape
    out_f = w_t.shape[1]
    split, _, rank = A.shape
    assert out_f % split == 0
    out_per_split = out_f // split
    sr = split * rank
    M = batch * seq

    # ---- Fuse LoRA factors in the wrapper (exact algebra) -------------------
    # A_all[:, s*rank:(s+1)*rank] = A[s]  ->  one x @ A_all matmul in-kernel.
    a_all = jnp.transpose(A, (1, 0, 2)).reshape(in_f, sr)
    # Block-diagonal B_full with alpha folded in: output column slab s only
    # sees split s's factors, which reproduces concat([x@A_s@B_s]) * alpha.
    b_full = jnp.zeros((sr, out_f), jnp.float32)
    for s in range(split):
        b_full = b_full.at[s * rank:(s + 1) * rank,
                           s * out_per_split:(s + 1) * out_per_split].set(
                               B[s].astype(jnp.float32))
    b_full = b_full * jnp.float32(alpha)

    # ---- Cast to bf16 and zero-pad to tile multiples ------------------------
    tm = min(tm, _round_up(M, 8))
    tn = min(tn, _round_up(out_f, 128))
    tk = min(tk, _round_up(in_f, 128))
    Mp, Kp, Np = _round_up(M, tm), _round_up(in_f, tk), _round_up(out_f, tn)

    x2d = jnp.pad(x.reshape(M, in_f).astype(compute_dtype),
                  ((0, Mp - M), (0, Kp - in_f)))
    w_p = jnp.pad(w_t.astype(compute_dtype), ((0, Kp - in_f), (0, Np - out_f)))
    bias_p = jnp.pad(bias.astype(jnp.float32), (0, Np - out_f)).reshape(1, Np)
    a_p = jnp.pad(a_all.astype(compute_dtype), ((0, Kp - in_f), (0, 0)))
    b_p = jnp.pad(b_full.astype(compute_dtype), ((0, 0), (0, Np - out_f)))

    grid = (Mp // tm, Np // tn, Kp // tk)

    out2d = pl.pallas_call(
        _lora_kernel,
        out_shape=jax.ShapeDtypeStruct((Mp, Np), x.dtype),
        grid_spec=pltpu.PrefetchScalarGridSpec(
            num_scalar_prefetch=0,
            grid=grid,
            in_specs=[
                pl.BlockSpec((tm, tk), lambda i, j, k: (i, k)),   # x
                pl.BlockSpec((tk, tn), lambda i, j, k: (k, j)),   # W (transposed)
                pl.BlockSpec((1, tn), lambda i, j, k: (0, j)),    # bias
                pl.BlockSpec((tk, sr), lambda i, j, k: (k, 0)),   # A_all (tiny)
                pl.BlockSpec((sr, tn), lambda i, j, k: (0, j)),   # B_full slab
            ],
            out_specs=pl.BlockSpec((tm, tn), lambda i, j, k: (i, j)),
            scratch_shapes=[
                pltpu.VMEM((tm, tn), jnp.float32),  # base matmul accumulator
                pltpu.VMEM((tm, sr), jnp.float32),  # x @ A_all accumulator
            ],
        ),
        compiler_params=pltpu.CompilerParams(
            dimension_semantics=("parallel", "parallel", "arbitrary"),
            # Tiles here are small; raise toward ~64-100 MiB when sweeping
            # larger tiles on v5e/v6e, and re-derive for v7x's 64 MiB VMEM.
            vmem_limit_bytes=32 * 1024 * 1024,
        ),
    )(x2d, w_p, bias_p, a_p, b_p)

    return out2d[:M, :out_f].reshape(batch, seq, out_f)


def reference_forward(x, w_t, bias, A, B, *, alpha, compute_dtype=jnp.bfloat16):
    """Module-faithful math (per-split x@A_s@B_s, concat, * alpha, + linear)
    using the same bf16-operand / f32-accumulate numerics as the kernel."""
    xc = x.astype(compute_dtype)
    base = jnp.einsum("bsi,io->bso", xc, w_t.astype(compute_dtype),
                      preferred_element_type=jnp.float32)
    split = A.shape[0]
    pieces = []
    for s in range(split):
        xa = jnp.einsum("bsi,ir->bsr", xc, A[s].astype(compute_dtype),
                        preferred_element_type=jnp.float32)
        pieces.append(jnp.einsum(
            "bsr,ro->bso", xa, B[s].astype(compute_dtype).astype(jnp.float32),
            preferred_element_type=jnp.float32))
    lora = jnp.concatenate(pieces, axis=-1) * jnp.float32(alpha)
    return (base + lora + bias.astype(jnp.float32)).astype(x.dtype)


if __name__ == "__main__":
    # Small-but-tileable shapes: grid = (2, 2, 2) so the pipeline, accumulator
    # init/finalize, and per-split column slabs are all exercised.
    batch, seq = 2, 128
    in_features, out_features = 512, 512
    rank, alpha, split = 4, 8, 2
    out_per_split = out_features // split

    key = jax.random.PRNGKey(0)
    kx, kw, kb, ka, kbb = jax.random.split(key, 5)
    dtype = jnp.float32

    x = jax.random.normal(kx, (batch, seq, in_features), dtype)

    # Base nn.Linear params (stored transposed as (in, out)).
    bound = 1.0 / math.sqrt(in_features)
    w_t = jax.random.uniform(kw, (in_features, out_features), dtype, -bound, bound)
    bias = jax.random.uniform(kb, (out_features,), dtype, -bound, bound)

    # LoRA factors. Module init uses A ~ randn/sqrt(rank), B = zeros; zero B
    # makes the adaptation a no-op, so B uses small random values here to
    # exercise the kernel path while keeping identical semantics/shapes.
    A = jax.random.normal(ka, (split, in_features, rank), dtype) / math.sqrt(rank)
    B = 0.02 * jax.random.normal(kbb, (split, rank, out_per_split), dtype)

    out = lora_forward(x, w_t, bias, A, B, alpha=float(alpha),
                       tm=128, tn=256, tk=256)
    out = jax.block_until_ready(out)

    ref = reference_forward(x, w_t, bias, A, B, alpha=float(alpha))
    assert out.shape == (batch, seq, out_features)
    assert jnp.allclose(out, ref, atol=5e-3, rtol=5e-3), "mismatch vs reference"

    print("KERNEL_OK")
</pallas_src>

<mosaic_0001>
module attributes {stable_mosaic.version = 11 : i64} {
  func.func @_lora_kernel(%arg0: i32, %arg1: i32, %arg2: i32, %arg3: memref<128x256xbf16, #tpu.memory_space<vmem>>, %arg4: memref<256x256xbf16, #tpu.memory_space<vmem>>, %arg5: memref<1x256xf32, #tpu.memory_space<vmem>>, %arg6: memref<256x8xbf16, #tpu.memory_space<vmem>>, %arg7: memref<8x256xbf16, #tpu.memory_space<vmem>>, %arg8: memref<128x256xf32, #tpu.memory_space<vmem>>, %arg9: memref<128x256xf32, #tpu.memory_space<vmem>>, %arg10: memref<128x8xf32, #tpu.memory_space<vmem>>) attributes {dimension_semantics = [#tpu.dimension_semantics<parallel>, #tpu.dimension_semantics<parallel>, #tpu.dimension_semantics<arbitrary>], iteration_bounds = array<i64: 2, 2, 2>, scalar_prefetch = 0 : i64, scratch_operands = 2 : i64, tpu.core_type = #tpu.core_type<tc>, window_params = [{transform_indices = @transform_0, window_bounds = array<i64: 128, 256>}, {transform_indices = @transform_1, window_bounds = array<i64: 256, 256>}, {transform_indices = @transform_2, window_bounds = array<i64: 1, 256>}, {transform_indices = @transform_3, window_bounds = array<i64: 256, 8>}, {transform_indices = @transform_4, window_bounds = array<i64: 8, 256>}, {transform_indices = @transform_5, window_bounds = array<i64: 128, 256>}]} {
    %c0_i32 = arith.constant 0 : i32
    %0 = arith.cmpi eq, %arg2, %c0_i32 : i32
    %1 = arith.extui %0 : i1 to i32
    %c0_i32_0 = arith.constant 0 : i32
    %2 = arith.cmpi ne, %1, %c0_i32_0 : i32
    scf.if %2 {
      %cst_16 = arith.constant 0.000000e+00 : f32
      %17 = vector.broadcast %cst_16 : f32 to vector<128x256xf32>
      %c0_17 = arith.constant 0 : index
      %c0_18 = arith.constant 0 : index
      %18 = vector.load %arg9[%c0_17, %c0_18] : memref<128x256xf32, #tpu.memory_space<vmem>>, vector<128x256xf32>
      tpu.vector_store %arg9[%c0_17, %c0_18], %17 {strides = array<i32>} : memref<128x256xf32, #tpu.memory_space<vmem>>, vector<128x256xf32>,
      %cst_19 = arith.constant 0.000000e+00 : f32
      %19 = vector.broadcast %cst_19 : f32 to vector<128x8xf32>
      %c0_20 = arith.constant 0 : index
      %c0_21 = arith.constant 0 : index
      %20 = vector.load %arg10[%c0_20, %c0_21] : memref<128x8xf32, #tpu.memory_space<vmem>>, vector<128x8xf32>
      tpu.vector_store %arg10[%c0_20, %c0_21], %19 {strides = array<i32>} : memref<128x8xf32, #tpu.memory_space<vmem>>, vector<128x8xf32>,
    } else {
    }
    %c0 = arith.constant 0 : index
    %c0_1 = arith.constant 0 : index
    %3 = vector.load %arg3[%c0, %c0_1] : memref<128x256xbf16, #tpu.memory_space<vmem>>, vector<128x256xbf16>
    %c0_2 = arith.constant 0 : index
    %c0_3 = arith.constant 0 : index
    %4 = vector.load %arg9[%c0_2, %c0_3] : memref<128x256xf32, #tpu.memory_space<vmem>>, vector<128x256xf32>
    %c0_4 = arith.constant 0 : index
    %c0_5 = arith.constant 0 : index
    %5 = vector.load %arg4[%c0_4, %c0_5] : memref<256x256xbf16, #tpu.memory_space<vmem>>, vector<256x256xbf16>
    %cst = arith.constant dense<0.000000e+00> : vector<128x256xf32>
    %6 = tpu.matmul %3, %5, %cst {dimension_numbers = #tpu.dot_dimension_numbers<[1], [0], [0], [1], [0, 0, 1, 1], [], []>} : vector<128x256xbf16>, vector<256x256xbf16>, vector<128x256xf32> -> vector<128x256xf32>
    %7 = arith.addf %4, %6 : vector<128x256xf32>
    %c0_6 = arith.constant 0 : index
    %c0_7 = arith.constant 0 : index
    %8 = vector.load %arg9[%c0_6, %c0_7] : memref<128x256xf32, #tpu.memory_space<vmem>>, vector<128x256xf32>
    tpu.vector_store %arg9[%c0_6, %c0_7], %7 {strides = array<i32>} : memref<128x256xf32, #tpu.memory_space<vmem>>, vector<128x256xf32>,
    %c0_8 = arith.constant 0 : index
    %c0_9 = arith.constant 0 : index
    %9 = vector.load %arg10[%c0_8, %c0_9] : memref<128x8xf32, #tpu.memory_space<vmem>>, vector<128x8xf32>
    %c0_10 = arith.constant 0 : index
    %c0_11 = arith.constant 0 : index
    %10 = vector.load %arg6[%c0_10, %c0_11] : memref<256x8xbf16, #tpu.memory_space<vmem>>, vector<256x8xbf16>
    %cst_12 = arith.constant dense<0.000000e+00> : vector<128x8xf32>
    %11 = tpu.matmul %3, %10, %cst_12 {dimension_numbers = #tpu.dot_dimension_numbers<[1], [0], [0], [1], [0, 0, 1, 1], [], []>} : vector<128x256xbf16>, vector<256x8xbf16>, vector<128x8xf32> -> vector<128x8xf32>
    %12 = arith.addf %9, %11 : vector<128x8xf32>
    %c0_13 = arith.constant 0 : index
    %c0_14 = arith.constant 0 : index
    %13 = vector.load %arg10[%c0_13, %c0_14] : memref<128x8xf32, #tpu.memory_space<vmem>>, vector<128x8xf32>
    tpu.vector_store %arg10[%c0_13, %c0_14], %12 {strides = array<i32>} : memref<128x8xf32, #tpu.memory_space<vmem>>, vector<128x8xf32>,
    %c1_i32 = arith.constant 1 : i32
    %14 = arith.cmpi eq, %arg2, %c1_i32 : i32
    %15 = arith.extui %14 : i1 to i32
    %c0_i32_15 = arith.constant 0 : i32
    %16 = arith.cmpi ne, %15, %c0_i32_15 : i32
    scf.if %16 {
      %c0_16 = arith.constant 0 : index
      %c0_17 = arith.constant 0 : index
      %17 = vector.load %arg10[%c0_16, %c0_17] : memref<128x8xf32, #tpu.memory_space<vmem>>, vector<128x8xf32>
      %c0_18 = arith.constant 0 : index
      %c0_19 = arith.constant 0 : index
      %18 = vector.load %arg7[%c0_18, %c0_19] : memref<8x256xbf16, #tpu.memory_space<vmem>>, vector<8x256xbf16>
      %19 = arith.extf %18 : vector<8x256xbf16> to vector<8x256xf32>
      %cst_20 = arith.constant dense<0.000000e+00> : vector<128x256xf32>
      %20 = tpu.matmul %17, %19, %cst_20 {dimension_numbers = #tpu.dot_dimension_numbers<[1], [0], [0], [1], [0, 0, 1, 1], [], []>} : vector<128x8xf32>, vector<8x256xf32>, vector<128x256xf32> -> vector<128x256xf32>
      %c0_21 = arith.constant 0 : index
      %c0_22 = arith.constant 0 : index
      %21 = vector.load %arg9[%c0_21, %c0_22] : memref<128x256xf32, #tpu.memory_space<vmem>>, vector<128x256xf32>
      %22 = arith.addf %21, %20 : vector<128x256xf32>
      %c0_23 = arith.constant 0 : index
      %c0_24 = arith.constant 0 : index
      %23 = vector.load %arg5[%c0_23, %c0_24] : memref<1x256xf32, #tpu.memory_space<vmem>>, vector<1x256xf32>
      %24 = vector.broadcast %23 : vector<1x256xf32> to vector<128x256xf32>
      %25 = arith.addf %22, %24 : vector<128x256xf32>
      %c0_25 = arith.constant 0 : index
      %c0_26 = arith.constant 0 : index
      %26 = vector.load %arg8[%c0_25, %c0_26] : memref<128x256xf32, #tpu.memory_space<vmem>>, vector<128x256xf32>
      tpu.vector_store %arg8[%c0_25, %c0_26], %25 {strides = array<i32>} : memref<128x256xf32, #tpu.memory_space<vmem>>, vector<128x256xf32>,
    } else {
    }
    return
  }
  func.func @transform_0(%arg0: i32, %arg1: i32, %arg2: i32) -> (i32, i32) {
    %c0_i32 = arith.constant 0 : i32
    return %arg0, %arg2 : i32, i32
  }
  func.func @transform_1(%arg0: i32, %arg1: i32, %arg2: i32) -> (i32, i32) {
    %c0_i32 = arith.constant 0 : i32
    return %arg2, %arg1 : i32, i32
  }
  func.func @transform_2(%arg0: i32, %arg1: i32, %arg2: i32) -> (i32, i32) {
    %c0_i32 = arith.constant 0 : i32
    %c0_i32_0 = arith.constant 0 : i32
    return %c0_i32, %arg1 : i32, i32
  }
  func.func @transform_3(%arg0: i32, %arg1: i32, %arg2: i32) -> (i32, i32) {
    %c0_i32 = arith.constant 0 : i32
    %c0_i32_0 = arith.constant 0 : i32
    return %arg2, %c0_i32 : i32, i32
  }
  func.func @transform_4(%arg0: i32, %arg1: i32, %arg2: i32) -> (i32, i32) {
    %c0_i32 = arith.constant 0 : i32
    %c0_i32_0 = arith.constant 0 : i32
    return %c0_i32, %arg1 : i32, i32
  }
  func.func @transform_5(%arg0: i32, %arg1: i32, %arg2: i32) -> (i32, i32) {
    %c0_i32 = arith.constant 0 : i32
    return %arg0, %arg1 : i32, i32
  }
}

</mosaic_0001>

<bundles_post_ra>
// kernel: tpu_custom_call.1
= control target key start
LH: loop header
LB: loop body
LE: loop exit
PB: predicated region body
PF: predicated region fallthrough
CT: control target
= control target key end

     0   :  { %s3057_s0 = inlined_call_operand.hbm [shape: bf16[256,512], index: 0, kind: input, shape index: {}]   ;;  %s3058_s1 = inlined_call_operand.hbm [shape: bf16[512,512], index: 1, kind: input, shape index: {}]   ;;  %s3059_s2 = inlined_call_operand.vmem [shape: f32[1,512], index: 2, kind: input, shape index: {}]   ;;  %s3060_s3 = inlined_call_operand.vmem [shape: bf16[512,8], index: 3, kind: input, shape index: {}]   ;;  %s3061_s4 = inlined_call_operand.vmem [shape: bf16[8,512], index: 4, kind: input, shape index: {}]   ;;  %s3062_s5 = inlined_call_operand.hbm [shape: f32[256,512], index: 5, kind: output, shape index: {}]  }
   0x1   :  { %3085 = sst [smem:[#allocation27_spill]] %s3057_s0 }
   0x2   :  { %3086 = sst [smem:[#allocation28_spill]] %s3058_s1 }
   0x3   :  { %3087 = sst [smem:[#allocation29_spill]] %s3059_s2 }
   0x4   :  { %3088 = sst [smem:[#allocation30_spill]] %s3060_s3 }
   0x5   :  { %3089 = sst [smem:[#allocation31_spill]] %s3061_s4 }
   0x6   :  { %3090 = sst [smem:[#allocation32_spill]] %s3062_s5 }
   0x7   :  { %10 = vsyncpa [#allocation5], 0 }
   0x8   :  { %12 = vsyncpa [#allocation5 + $0x1], 0 }
   0x9   :  { %13 = vsyncpa [#allocation8], 0 }
   0xa   :  { %15 = vsyncpa [#allocation8 + $0x1], 0 }
   0xb   :  { %16 = vsyncpa [#allocation6], 0 }
   0xc   :  { %18 = vsyncpa [#allocation6 + $0x1], 0  ;;  %s2445_s18 = smov 0   ;;  %s2447_s19 = smov 0  }
   0xd   :  { %s2449_s20 = smov 0   ;;  %s2451_s21 = smov 0  }
   0xe   :  { %s2453_s22 = smov 0   ;;  %s2455_s23 = smov 0  }
   0xf   :  { %s2457_s24 = smov 0   ;;  %s2459_s25 = smov 0  }
  0x10   :  { %s2461_s26 = smov 0   ;;  %s2463_s27 = smov 0  }
  0x11   :  { %s2465_s28 = smov 0   ;;  %s2467_s29 = smov 0  }
  0x12   :  { %s2469_s30 = smov 0   ;;  %s2471_s6 = smov 0  }
  0x13   :  { %s2473_s7 = smov 0   ;;  %s2475_s8 = smov 0  }
  0x14 LB: > { %3091 = sst [smem:[#allocation13_spill]] %s2370_s25  ;;  %s1752_s9 = sadd.s32 4294967295, %s2402_s8   ;;  %s2402_s8 = sphi %s2475_s8, %s24_s8   ;;  %s2398_s7 = sphi %s2473_s7, %s3154_s7   ;;  %s2394_s6 = sphi %s2471_s6, %s3153_s6   ;;  %s2390_s30 = sphi %s2469_s30, %s3152_s30   ;;  %s2386_s29 = sphi %s2467_s29, %s3151_s29   ;;  %s2382_s28 = sphi %s2465_s28, %s3150_s28   ;;  %s2378_s27 = sphi %s2463_s27, %s3161_s27   ;;  %s2374_s26 = sphi %s2461_s26, %s3148_s26   ;;  %s2370_s25 = sphi %s2459_s25, %s3147_s25   ;;  %s2366_s24 = sphi %s2457_s24, %s3146_s24   ;;  %s2362_s23 = sphi %s2455_s23, %s3160_s23   ;;  %s2358_s22 = sphi %s2453_s22, %s3159_s22   ;;  %s2354_s21 = sphi %s2451_s21, %s3158_s21   ;;  %s2350_s20 = sphi %s2449_s20, %s3157_s20   ;;  %s2346_s19 = sphi %s2447_s19, %s3156_s19   ;;  %s2342_s18 = sphi %s2445_s18, %s3155_s18  }
  0x15   : > { %3092 = sst [smem:[#allocation14_spill]] %s2374_s26  ;;  %s36_s10 = sadd.s32 1, %s2390_s30 }
  0x16   : > { %3093 = sst [smem:[#allocation15_spill]] %s2378_s27  ;;  %p2525_p0 = scmp.ge.s32.totalorder %s36_s10, 2 }
  0x17   : > { %3094 = sst [smem:[#allocation16_spill]] %s2382_s28  ;;  %p59_p1 = scmp.ne.s32.totalorder %s2374_s26, %s2370_s25 }
  0x18   : > { %3095 = sst [smem:[#allocation17_spill]] %s2386_s29  ;;  %s3163_s10 = smov (%p2525_p0, %s36_s10), 0 }
  0x19   : > { %3096 = sst [smem:[#allocation18_spill]] %s2390_s30  ;;  %p3069_p2 = scmp.eq.s32.totalorder %s2402_s8, 0 }
  0x1a   : > { %3097 = sst [smem:[#allocation19_spill]] %s2394_s6  ;;  %p65_p3 = scmp.ne.s32.totalorder %s2370_s25, %s2366_s24 }
  0x1b   : > { %3098 = sst [smem:[#allocation20_spill]] %s2398_s7  ;;  %s2541_s14 = ssub.s32 %s2390_s30, %s3163_s10 }
  0x1c   : > { %3100 = sst [smem:[#allocation21_spill]] %s3163_s10  ;;  %p2543_p4 = scmp.eq.s32.totalorder %s1752_s9, 0 }
  0x1d   : > { %p2549_p5 = por %p3069_p2, %p59_p1  ;;  %p2553_p6 = scmp.eq.s32.totalorder %s1752_s9, 7 }
  0x1e   : > { %s3101_s15 = scalar_select %p2543_p4, 1, 0 }
  0x1f   : > { %s3103_s17 = scalar_select %p2553_p6, 1, 0 }
  0x20   : > { %p2559_p7 = por %p2543_p4, %p65_p3  ;;  %p3068_p8 = scmp.lt.s32.totalorder %s2402_s8, 8 }
  0x21   : > { %s223_s13 = sand.u32 1, %s2374_s26   ;;  %s1758_s10 = sshll.u32 %s2390_s30, 1 }
  0x22   : > { %s3104_s24 = scalar_select %p2559_p7, 1, 0 }
  0x23   : > { %s1756_s12 = sshll.u32 %s223_s13, 7  ;;  %s1864_s5 = sshll.u32 %s2398_s7, 6 }
  0x24   : > { %3105 = sst [smem:[#allocation22_spill]] %s3104_s24  ;;  %s227_s29 = scalar_lea.vmem [#allocation4], %s1756_s12 }
  0x25   : > { %s237_s3 = sshll.u32 %s227_s29, 4  ;;  %s234_s4 = sadd.s32 %s1864_s5, %s1758_s10  ;;  %s2567_s3 = int_to_ptr.vmem [resolvable:$true] %s237_s3 }
  0x26   : > { %s1760_s2 = sshll.u32 %s234_s4, 6  ;;  %p2573_p9 = pnand %p3068_p8, %p2549_p5 }
  0x27   : > { %s3107_s0 = sld [smem:[#allocation27_spill]]  ;;  %s2583_s5 = scalar_lea.sflag [#allocation5], %s223_s13 }
  0x28   : > { %p2178_p12 = pneg %p2573_p9 }
  0x2d   : > { %s2580_s24 = scalar_lea.hbm %s3107_s0, %s1760_s2  ;;  %s2181_s2 = scalar_lea.hbm %s3107_s0, 8192 }
  0x2e   : > { %s2176_s4 = scalar_lea.hbm %s2580_s24, 2048  ;;  %p2182_p3 = scmp.lt.u32.totalorder %s2580_s24, %s3107_s0 }
  0x2f   : > { %p2177_p11 = scmp.ne.s32.totalorder %s2580_s24, %s2176_s4  ;;  %p2183_p5 = scmp.lt.u32.totalorder %s2181_s2, %s2176_s4 }
  0x30   : > { %p2185_p2 = scmp.lt.u32.totalorder %s2176_s4, %s2580_s24 }
  0x31   : > { %p2179_p13 = pnand %p2178_p12, %p2177_p11  ;;  %p2184_p8 = por %p2183_p5, %p2182_p3 }
  0x33   : > { %p2180_p1 = pneg %p2179_p13  ;;  %p2186_p10 = por %p2185_p2, %p2184_p8 }
  0x35   : > { %p2187_p7 = pnand %p2186_p10, %p2180_p1 }
  0x37   : > { %2190 = shalt.err (!%p2187_p7)
}
  0x38   : > { %s2191_s12 = scalar_lea.vmem %s2567_s3, 2048  ;;  %s2404_s13 = smov [#allocation4]  }
  0x39   : > { %p2192_p11 = scmp.ne.s32.totalorder %s2567_s3, %s2191_s12  ;;  %s2196_s16 = sshll.u32 %s2404_s13, 4  ;;  %s2197_s16 = int_to_ptr.vmem [resolvable:$false] %s2196_s16 }
  0x3a   : > { %s2198_s27 = scalar_lea.vmem %s2197_s16, 4096  ;;  %p2199_p4 = scmp.lt.s32.totalorder %s2567_s3, %s2197_s16 }
  0x3b   : > { %p2194_p13 = pnand %p2192_p11, %p2178_p12  ;;  %p2200_p3 = scmp.lt.s32.totalorder %s2198_s27, %s2191_s12 }
  0x3d   : > { %p2195_p6 = pneg %p2194_p13  ;;  %p2201_p5 = por %p2200_p3, %p2199_p4 }
  0x3f   : > { %p2202_p2 = pnand %p2201_p5, %p2195_p6 }
  0x41   : > { %2205 = shalt.err (!%p2202_p2)
}
  0x42   : > { %s3072_s4 = smov 256   ;;  %s3073_s28 = smov 128  }
  0x43   : > { %s3074_s2 = smov 8   ;;  %p295_p4 = scmp.lt.s32.totalorder %s2402_s8, 9 }
  0x44   : > { %1942 = dma.hbm_to_vmem [thread:$0]  (!%p2573_p9), %s2580_s24, 2048, %s2567_s3, %s2583_s5, %s3072_s4, %s3073_s28, %s3074_s2  }
  0x45   : > { %p3108_p6 = scmp.ge.s32.totalorder %s2402_s8, 1  ;;  %s1753_s10 = sadd.s32 4294967294, %s2402_s8  }
  0x46   : > { %s39_s12 = sadd.s32 1, %s2394_s6  ;;  %s80_s9 = sadd.s32 1, %s2362_s23 }
  0x47   : > { %p2617_p7 = pnand %p3108_p6, %p295_p4  ;;  %s3165_s12 = smov (!%p2525_p0, %s39_s12), %s2394_s6 }
  0x48   : > { %p87_p8 = scmp.ne.s32.totalorder %s2362_s23, %s2358_s22  ;;  %p41_p10 = scmp.ge.s32.totalorder %s3165_s12, 2 }
  0x49   : > { %p93_p9 = scmp.ne.s32.totalorder %s2358_s22, %s2354_s21  ;;  %p3110_p12 = scmp.eq.s32.totalorder %s2402_s8, 0 }
  0x4a   : > { %s186_s24 = sadd.s32 1, %s2350_s20  ;;  %s3167_s12 = smov (%p41_p10, %s3165_s12), 0 }
  0x4b   : > { %p2633_p1 = por %p87_p8, %p3110_p12  ;;  %3112 = sst [smem:[#allocation23_spill]] %s3167_s12 }
  0x4c   : > { %s3113_s5 = sadd.s32 1, %s2398_s7  ;;  %s76_s11 = ssub.s32 %s2394_s6, %s3167_s12 }
  0x4d   : > { %s3169_s5 = smov (!%p41_p10, %s3113_s5), %s2398_s7  ;;  %p3114_p0 = scmp.ne.s32.totalorder %s3101_s15, 0 }
  0x4e   : > { %p45_p13 = scmp.ge.s32.totalorder %s3169_s5, 2  ;;  %s77_s21 = sor.u32 %s76_s11, %s2541_s14 }
  0x4f   : > { %p2647_p11 = por %p93_p9, %p3114_p0  ;;  %p78_p3 = scmp.eq.s32.totalorder %s77_s21, 0 }
  0x50   : > { %p196_p5 = scmp.ne.s32.totalorder %s2350_s20, %s2346_s19  ;;  %s3171_s5 = smov (%p45_p13, %s3169_s5), 0 }
  0x51   : > { %s3115_s13 = scalar_select %p2647_p11, 1, 0 }
  0x52   : > { %3116 = sst [smem:[#allocation24_spill]] %s3171_s5  ;;  %s47_s15 = ssub.s32 %s2398_s7, %s3171_s5 }
  0x53   : > { %s2657_s16 = scalar_select %p78_p3, %s2362_s23, %s80_s9  }
  0x54   : > { %p3118_p2 = scmp.ne.s32.totalorder %s3103_s17, 0  ;;  %s49_s4 = sor.u32 %s2541_s14, %s47_s15 }
  0x55   : > { %3117 = sst [smem:[#allocation25_spill]] %s2657_s16  ;;  %s183_s28 = sor.u32 %s76_s11, %s47_s15 }
  0x56   : > { %p2663_p4 = por %p3118_p2, %p196_p5  ;;  %p50_p6 = scmp.eq.s32.totalorder %s49_s4, 0 }
  0x57   : > { %p184_p8 = scmp.eq.s32.totalorder %s183_s28, 0  ;;  %p202_p10 = scmp.ne.s32.totalorder %s2346_s19, %s2342_s18 }
  0x58   : > { %s3119_s27 = scalar_select %p2663_p4, 1, 0 }
  0x59   : > { %p203_p9 = scmp.eq.s32.totalorder %s1753_s10, 7  ;;  %s3120_s21 = sadd.s32 1, %s2374_s26 }
  0x5a   : > { %s2673_s2 = scalar_select %p50_p6, %s2374_s26, %s3120_s21  }
  0x5b   : > { %s2676_s0 = scalar_select %p184_p8, %s2350_s20, %s186_s24  }
  0x5c   : > { %3121 = sst [smem:[#allocation26_spill]] %s2673_s2  ;;  %p2678_p12 = por %p203_p9, %p202_p10 }
  0x5d   : > { %s247_s17 = sand.u32 1, %s2362_s23   ;;  %s1763_s12 = sshll.u32 %s2394_s6, 1 }
  0x5e   : > { %s3122_s9 = scalar_select %p2678_p12, 1, 0 }
  0x5f   : > { %s1761_s5 = sshll.u32 %s247_s17, 8  ;;  %s1865_s14 = sshll.u32 %s2390_s30, 7 }
  0x60   : > { %s251_s11 = scalar_lea.vmem [#allocation7], %s1761_s5  ;;  %s258_s15 = sadd.s32 %s1865_s14, %s1763_s12 }
  0x61   : > { %s261_s4 = sshll.u32 %s251_s11, 4  ;;  %s1765_s28 = sshll.u32 %s258_s15, 6  ;;  %s2685_s4 = int_to_ptr.vmem [resolvable:$true] %s261_s4 }
  0x62   : > { %p3123_p0 = scmp.lt.s32.totalorder %s2402_s8, 8  ;;  %s3125_s1 = sld [smem:[#allocation28_spill]] }
  0x63   : > { %s2700_s12 = scalar_lea.sflag [#allocation8], %s247_s17 }
  0x64   : > { %p2691_p13 = pnand %p3123_p0, %p2633_p1 }
  0x66   : > { %p2208_p1 = pneg %p2691_p13 }
  0x68   : > { %s2698_s7 = scalar_lea.hbm %s3125_s1, %s1765_s28  ;;  %s2211_s11 = scalar_lea.hbm %s3125_s1, 16384 }
  0x69   : > { %s2206_s5 = scalar_lea.hbm %s2698_s7, 4096  ;;  %p2212_p6 = scmp.lt.u32.totalorder %s2698_s7, %s3125_s1 }
  0x6a   : > { %p2207_p3 = scmp.ne.s32.totalorder %s2698_s7, %s2206_s5  ;;  %p2213_p8 = scmp.lt.u32.totalorder %s2211_s11, %s2206_s5 }
  0x6b   : > { %p2215_p9 = scmp.lt.u32.totalorder %s2206_s5, %s2698_s7 }
  0x6c   : > { %p2209_p5 = pnand %p2208_p1, %p2207_p3  ;;  %p2214_p10 = por %p2213_p8, %p2212_p6 }
  0x6e   : > { %p2210_p2 = pneg %p2209_p5  ;;  %p2216_p0 = por %p2215_p9, %p2214_p10 }
  0x70   : > { %p2217_p12 = pnand %p2216_p0, %p2210_p2 }
  0x72   : > { %2220 = shalt.err (!%p2217_p12)
}
  0x73   : > { %s2221_s17 = scalar_lea.vmem %s2685_s4, 4096  ;;  %s2408_s24 = smov [#allocation7]  }
  0x74   : > { %p2222_p3 = scmp.ne.s32.totalorder %s2685_s4, %s2221_s17  ;;  %s2226_s21 = sshll.u32 %s2408_s24, 4  ;;  %s2227_s21 = int_to_ptr.vmem [resolvable:$false] %s2226_s21 }
  0x75   : > { %s2228_s3 = scalar_lea.vmem %s2227_s21, 8192  ;;  %p2229_p11 = scmp.lt.s32.totalorder %s2685_s4, %s2227_s21 }
  0x76   : > { %p2224_p5 = pnand %p2222_p3, %p2208_p1  ;;  %p2230_p6 = scmp.lt.s32.totalorder %s2228_s3, %s2221_s17 }
  0x78   : > { %p2225_p4 = pneg %p2224_p5  ;;  %p2231_p8 = por %p2230_p6, %p2229_p11 }
  0x7a   : > { %p2232_p10 = pnand %p2231_p8, %p2225_p4 }
  0x7c   : > { %2235 = shalt.err (!%p2232_p10)
}
  0x7d   : > { %s3126_s5 = smov 8   ;;  %s3127_s14 = smov 128  }
  0x7e   : > { %s3128_s11 = smov 256   ;;  %299 = sbr.rel (%p2617_p7) target bundleno = 767 (0x2ff), region = 40 }
  0x7f   : > { %1945 = dma.hbm_to_vmem [thread:$0]  (!%p2691_p13), %s2698_s7, 4096, %s2685_s4, %s2700_s12, %s3128_s11, %s3127_s14, %s3126_s5  }
  0x80   : > { %s3129_s15 = sld [smem:[#allocation22_spill]] (!%p2617_p7)  ;;  %s301_s28 = sand.u32 (!%p2617_p7), 1, %s2370_s25  }
  0x81   : > { %s1767_s24 = sshll.u32 (!%p2617_p7), %s301_s28, 7  ;;  %s302_s17 = scalar_lea.sflag (!%p2617_p7), [#allocation5], %s301_s28 }
  0x82   : > { %s2734_s21 = scalar_lea.vmem (!%p2617_p7), [#allocation4], %s1767_s24 }
  0x86   : > { %p3130_p11 = scmp.ne.s32.totalorder %s3129_s15, 0 }
  0x88   : > { %2329 = dma.done.wait (%p3130_p11), %s302_s17, 2048  }
  0x89   : > { %2331 = vsyncadd (%p3130_p11), %s302_s17, 4294965248  ;;  %s310_s10 = sand.u32 1, %s2358_s22   ;;  %p3131_p7 = scmp.ne.s32.totalorder %s3115_s13, 0 }
  0x8a   : > { %s1768_s3 = sshll.u32 %s310_s10, 8  ;;  %s311_s7 = scalar_lea.sflag [#allocation8], %s310_s10 }
  0x8b   : > { %s2741_s4 = scalar_lea.vmem [#allocation7], %s1768_s3 }
  0x8c   : > { %2333 = dma.done.wait (%p3131_p7), %s311_s7, 4096  }
  0x8d   : > { %2335 = vsyncadd (%p3131_p7), %s311_s7, 4294963200  ;;  %s3132_s29 = sld [smem:[#allocation16_spill]]  ;;  %s3133_s12 = sld [smem:[#allocation15_spill]] }
  0x8e   : > { %s3082_s5 = sand.u32 1, %s2346_s19   ;;  %s3134_s17 = sld [smem:[#allocation29_spill]] }
  0x8f   : > { %s1769_s11 = sshll.u32 %s3082_s5, 8  ;;  %s3135_s1 = sld [smem:[#allocation31_spill]] }
  0x90   : > { %s3136_s26 = sld [smem:[#allocation30_spill]]  ;;  %s2773_s16 = scalar_lea.vmem [#allocation9], %s1769_s11 }
  0x93   : > { %s2749_s14 = sshll.u32 %s3132_s29, 1  ;;  %s1771_s15 = sshll.u32 %s3133_s12, 5 }
  0x94   : > { %p365_p4 = scmp.lt.s32.totalorder %s2749_s14, 3  ;;  %p370_p12 = scmp.lt.s32.totalorder %s1771_s15, 63 }
  0x95   : > { %p1775_p13 = scmp.ne.s32.totalorder %s3133_s12, 0 }
  0x96   : > { %s2756_s28 = scalar_select %p365_p4, %s2749_s14, 3 }
  0x97   : > { %s3173_s15 = smov (!%p370_p12, %s1771_s15), 63  ;;  %387 = sbr.rel (%p1775_p13) target bundleno = 177 (0xb1), region = 52 }
  0x98   : > { %s367_s10 = scalar_lea.vmem %s3134_s17, %s2756_s28  ;;  %s1774_s3 = sshll.u32 %s2756_s28, 2  ;;  %vm420_vm0 = vcmask (!%p1775_p13), 64512   ;;  %v2409_v0 = vmov (!%p1775_p13), 0.0  }
  0x99   : > { %s2766_s6 = scalar_lea.vmem %s3135_s1, %s1774_s3  ;;  %s1772_s30 = sshll.u32 %s3173_s15, 2  ;;  %388 = vst [vmem:[#allocation2] sm:$0xff] (!%p1775_p13), %v2409_v0  ;;  %389 = vst [vmem:[#allocation2 + $0x8] sm:$0xff] (!%p1775_p13), %v2409_v0 }
  0x9a   : > { %s2771_s25 = scalar_lea.vmem %s3136_s26, %s1772_s30  ;;  %390 = vst [vmem:[#allocation2 + $0x10] sm:$0xff] (!%p1775_p13), %v2409_v0  ;;  %391 = vst [vmem:[#allocation2 + $0x18] sm:$0xff] (!%p1775_p13), %v2409_v0 }
  0x9b   : > { %392 = vst [vmem:[#allocation2 + $0x20] sm:$0xff] (!%p1775_p13), %v2409_v0  ;;  %393 = vst [vmem:[#allocation2 + $0x28] sm:$0xff] (!%p1775_p13), %v2409_v0 }
  0x9c   : > { %394 = vst [vmem:[#allocation2 + $0x30] sm:$0xff] (!%p1775_p13), %v2409_v0  ;;  %395 = vst [vmem:[#allocation2 + $0x38] sm:$0xff] (!%p1775_p13), %v2409_v0 }
  0x9d   : > { %396 = vst [vmem:[#allocation2 + $0x40] sm:$0xff] (!%p1775_p13), %v2409_v0  ;;  %397 = vst [vmem:[#allocation2 + $0x48] sm:$0xff] (!%p1775_p13), %v2409_v0 }
  0x9e   : > { %398 = vst [vmem:[#allocation2 + $0x50] sm:$0xff] %v2409_v0  ;;  %399 = vst [vmem:[#allocation2 + $0x58] sm:$0xff] %v2409_v0 }
  0x9f   : > { %400 = vst [vmem:[#allocation2 + $0x60] sm:$0xff] %v2409_v0  ;;  %401 = vst [vmem:[#allocation2 + $0x68] sm:$0xff] %v2409_v0 }
  0xa0   : > { %402 = vst [vmem:[#allocation2 + $0x70] sm:$0xff] %v2409_v0  ;;  %403 = vst [vmem:[#allocation2 + $0x78] sm:$0xff] %v2409_v0 }
  0xa1   : > { %404 = vst [vmem:[#allocation2 + $0x80] sm:$0xff] %v2409_v0  ;;  %405 = vst [vmem:[#allocation2 + $0x88] sm:$0xff] %v2409_v0 }
  0xa2   : > { %406 = vst [vmem:[#allocation2 + $0x90] sm:$0xff] %v2409_v0  ;;  %407 = vst [vmem:[#allocation2 + $0x98] sm:$0xff] %v2409_v0 }
  0xa3   : > { %408 = vst [vmem:[#allocation2 + $0xa0] sm:$0xff] %v2409_v0  ;;  %409 = vst [vmem:[#allocation2 + $0xa8] sm:$0xff] %v2409_v0 }
  0xa4   : > { %410 = vst [vmem:[#allocation2 + $0xb0] sm:$0xff] %v2409_v0  ;;  %411 = vst [vmem:[#allocation2 + $0xb8] sm:$0xff] %v2409_v0 }
  0xa5   : > { %412 = vst [vmem:[#allocation2 + $0xc0] sm:$0xff] %v2409_v0  ;;  %413 = vst [vmem:[#allocation2 + $0xc8] sm:$0xff] %v2409_v0 }
  0xa6   : > { %414 = vst [vmem:[#allocation2 + $0xd0] sm:$0xff] %v2409_v0  ;;  %415 = vst [vmem:[#allocation2 + $0xd8] sm:$0xff] %v2409_v0 }
  0xa7   : > { %416 = vst [vmem:[#allocation2 + $0xe0] sm:$0xff] %v2409_v0  ;;  %417 = vst [vmem:[#allocation2 + $0xe8] sm:$0xff] %v2409_v0 }
  0xa8   : > { %418 = vst [vmem:[#allocation2 + $0xf0] sm:$0xff] %v2409_v0  ;;  %419 = vst [vmem:[#allocation2 + $0xf8] sm:$0xff] %v2409_v0 }
  0xa9   : > { %421 = vst.msk [vmem:[#allocation3] sm:$0xff] %vm420_vm0, %v2409_v0  ;;  %422 = vst.msk [vmem:[#allocation3 + $0x8] sm:$0xff] %vm420_vm0, %v2409_v0 }
  0xaa   : > { %423 = vst.msk [vmem:[#allocation3 + $0x10] sm:$0xff] %vm420_vm0, %v2409_v0  ;;  %424 = vst.msk [vmem:[#allocation3 + $0x18] sm:$0xff] %vm420_vm0, %v2409_v0 }
  0xab   : > { %425 = vst.msk [vmem:[#allocation3 + $0x20] sm:$0xff] %vm420_vm0, %v2409_v0  ;;  %426 = vst.msk [vmem:[#allocation3 + $0x28] sm:$0xff] %vm420_vm0, %v2409_v0 }
  0xac   : > { %427 = vst.msk [vmem:[#allocation3 + $0x30] sm:$0xff] %vm420_vm0, %v2409_v0  ;;  %428 = vst.msk [vmem:[#allocation3 + $0x38] sm:$0xff] %vm420_vm0, %v2409_v0 }
  0xad   : > { %429 = vst.msk [vmem:[#allocation3 + $0x40] sm:$0xff] %vm420_vm0, %v2409_v0  ;;  %430 = vst.msk [vmem:[#allocation3 + $0x48] sm:$0xff] %vm420_vm0, %v2409_v0 }
  0xae   : > { %431 = vst.msk [vmem:[#allocation3 + $0x50] sm:$0xff] %vm420_vm0, %v2409_v0  ;;  %432 = vst.msk [vmem:[#allocation3 + $0x58] sm:$0xff] %vm420_vm0, %v2409_v0 }
  0xaf   : > { %433 = vst.msk [vmem:[#allocation3 + $0x60] sm:$0xff] %vm420_vm0, %v2409_v0  ;;  %434 = vst.msk [vmem:[#allocation3 + $0x68] sm:$0xff] %vm420_vm0, %v2409_v0 }
  0xb0   : > { %435 = vst.msk [vmem:[#allocation3 + $0x70] sm:$0xff] %vm420_vm0, %v2409_v0  ;;  %436 = vst.msk [vmem:[#allocation3 + $0x78] sm:$0xff] %vm420_vm0, %v2409_v0 }
  0xb1 PF: > { %v2088_v1 = vld [vmem:[%s2741_s4 + $0x4] ss:$8 sps:$4 sm:$0xff]   ;;  %v2090_v2 = vld [vmem:[%s2741_s4] ss:$8 sps:$4 sm:$0xff]   ;;  %v2091_v3 = vld [vmem:[%s2741_s4 + $0x14] ss:$8 sps:$4 sm:$0xff]  }
  0xb2   : > { %757 = vmatprep.subr.bf16.mxu0 %v2088_v1  ;;  %v2093_v4 = vld [vmem:[%s2741_s4 + $0x10] ss:$8 sps:$4 sm:$0xff]   ;;  %v2094_v5 = vld [vmem:[%s2741_s4 + $0x24] ss:$8 sps:$4 sm:$0xff]   ;;  %v2096_v6 = vld [vmem:[%s2741_s4 + $0x20] ss:$8 sps:$4 sm:$0xff]  }
  0xb3   : > { %758 = vmatpush1.bf16.msra.mxu0 %v2090_v2  ;;  %v2097_v7 = vld [vmem:[%s2741_s4 + $0x34] ss:$8 sps:$4 sm:$0xff]   ;;  %v2109_v8 = vld [vmem:[%s2771_s25 + $0x40] sm:$0xff]   ;;  %v2099_v9 = vld [vmem:[%s2741_s4 + $0x30] ss:$8 sps:$4 sm:$0xff]   ;;  %vm1191_vm1 = vcmask 64512  }
  0xb4   : > { %759 = vmatprep.subr.bf16.mxu0 %v2091_v3  ;;  %v2100_v10 = vld [vmem:[%s2741_s4 + $0x44] ss:$8 sps:$4 sm:$0xff]   ;;  %1867 = vmatprep.subr.bf16.mxu1 %v2109_v8  ;;  %v2102_v13 = vld [vmem:[%s2741_s4 + $0x40] ss:$8 sps:$4 sm:$0xff]   ;;  %v2103_v14 = vld [vmem:[%s2741_s4 + $0x54] ss:$8 sps:$4 sm:$0xff]  }
  0xb5   : > { %v2112_v11 = vld [vmem:[%s2771_s25] sm:$0xff]   ;;  %v2114_v12 = vld [vmem:[%s2771_s25 + $0x48] sm:$0xff]   ;;  %v2119_v16 = vld [vmem:[%s2771_s25 + $0x50] sm:$0xff]   ;;  %s3137_s1 = sld [smem:[#allocation15_spill]] }
  0xb6   : > { %1868 = vmatpush3.bf16.msra.mxu1 %v2112_v11  ;;  %v2117_v15 = vld [vmem:[%s2771_s25 + $0x8] sm:$0xff]   ;;  %v2105_v17 = vld [vmem:[%s2741_s4 + $0x50] ss:$8 sps:$4 sm:$0xff]   ;;  %v2129_v23 = vld [vmem:[%s2771_s25 + $0x60] sm:$0xff]  }
  0xb7   : > { %760 = vmatpush1.bf16.msra.mxu0 %v2093_v4  ;;  %1869 = vmatprep.subr.bf16.mxu1 %v2114_v12  ;;  %v2122_v18 = vld [vmem:[%s2771_s25 + $0x10] sm:$0xff]   ;;  %v2106_v19 = vld [vmem:[%s2741_s4 + $0x64] ss:$8 sps:$4 sm:$0xff]   ;;  %v2124_v20 = vld [vmem:[%s2771_s25 + $0x58] sm:$0xff]  }
  0xb8   : > { %761 = vmatprep.subr.bf16.mxu0 %v2094_v5  ;;  %v2108_v21 = vld [vmem:[%s2741_s4 + $0x60] ss:$8 sps:$4 sm:$0xff]   ;;  %v2127_v22 = vld [vmem:[%s2771_s25 + $0x18] sm:$0xff]   ;;  %v2115_v28 = vld [vmem:[%s2741_s4 + $0x84] ss:$8 sps:$4 sm:$0xff]  }
  0xb9   : > { %v2110_v24 = vld [vmem:[%s2741_s4 + $0x74] ss:$8 sps:$4 sm:$0xff]   ;;  %v2113_v25 = vld [vmem:[%s2741_s4 + $0x70] ss:$8 sps:$4 sm:$0xff]   ;;  %v2132_v26 = vld [vmem:[%s2771_s25 + $0x20] sm:$0xff]  }
  0xba   : > { %1870 = vmatpush3.bf16.msra.mxu1 %v2117_v15  ;;  %v2134_v27 = vld [vmem:[%s2771_s25 + $0x68] sm:$0xff]   ;;  %v2139_v31 = vld [vmem:[%s2771_s25 + $0x70] sm:$0xff]   ;;  %v2144_v35 = vld [vmem:[%s2771_s25 + $0x78] sm:$0xff]  }
  0xbb   : > { %762 = vmatpush1.bf16.msra.mxu0 %v2096_v6  ;;  %1871 = vmatprep.subr.bf16.mxu1 %v2119_v16  ;;  %v2118_v29 = vld [vmem:[%s2741_s4 + $0x80] ss:$8 sps:$4 sm:$0xff]   ;;  %v2120_v32 = vld [vmem:[%s2741_s4 + $0x94] ss:$8 sps:$4 sm:$0xff]   ;;  %v2123_v34 = vld [vmem:[%s2741_s4 + $0x90] ss:$8 sps:$4 sm:$0xff]  }
  0xbc   : > { %763 = vmatprep.subr.bf16.mxu0 %v2097_v7  ;;  %v2137_v30 = vld [vmem:[%s2771_s25 + $0x28] sm:$0xff]   ;;  %v2142_v33 = vld [vmem:[%s2771_s25 + $0x30] sm:$0xff]   ;;  %v2147_v38 = vld [vmem:[%s2771_s25 + $0x38] sm:$0xff]   ;;  %p1840_p1 = scmp.ne.s32.totalorder %s3137_s1, 1 }
  0xbd   : > { %v2125_v36 = vld [vmem:[%s2741_s4 + $0xa4] ss:$8 sps:$4 sm:$0xff]   ;;  %v2128_v39 = vld [vmem:[%s2741_s4 + $0xa0] ss:$8 sps:$4 sm:$0xff]   ;;  %v2130_v40 = vld [vmem:[%s2741_s4 + $0xb4] ss:$8 sps:$4 sm:$0xff]  }
  0xbe   : > { %1872 = vmatpush3.bf16.msra.mxu1 %v2122_v18  ;;  %v2151_v37 = vld [vmem:[%s2734_s21 + $0x4] ss:$8 sps:$4 sm:$0xff]   ;;  %v2149_v41 = vld [vmem:[%s2734_s21] ss:$8 sps:$4 sm:$0xff]   ;;  %v2155_v42 = vld [vmem:[%s2734_s21 + $0x14] ss:$8 sps:$4 sm:$0xff]  }
  0xbf   : > { %764 = vmatpush1.bf16.msra.mxu0 %v2099_v9  ;;  %1873 = vmatprep.subr.bf16.mxu1 %v2124_v20  ;;  %v2133_v43 = vld [vmem:[%s2741_s4 + $0xb0] ss:$8 sps:$4 sm:$0xff]   ;;  %v2135_v44 = vld [vmem:[%s2741_s4 + $0xc4] ss:$8 sps:$4 sm:$0xff]   ;;  %v2138_v45 = vld [vmem:[%s2741_s4 + $0xc0] ss:$8 sps:$4 sm:$0xff]  }
  0xc0   : > { %765 = vmatprep.subr.bf16.mxu0 %v2100_v10  ;;  %1110 = vmatprep.mubr.bf16.mxu1 %v2151_v37  ;;  %v2140_v46 = vld [vmem:[%s2741_s4 + $0xd4] ss:$8 sps:$4 sm:$0xff]   ;;  %v2157_v47 = vld [vmem:[%s2734_s21 + $0x10] ss:$8 sps:$4 sm:$0xff]   ;;  %v2158_v48 = vld [vmem:[%s2734_s21 + $0x24] ss:$8 sps:$4 sm:$0xff]  }
  0xc1   : > { %789 = vmatprep.mubr.bf16.mxu0 %v2151_v37  ;;  %v2143_v49 = vld [vmem:[%s2741_s4 + $0xd0] ss:$8 sps:$4 sm:$0xff]   ;;  %v2145_v50 = vld [vmem:[%s2741_s4 + $0xe4] ss:$8 sps:$4 sm:$0xff]   ;;  %v2148_v51 = vld [vmem:[%s2741_s4 + $0xe0] ss:$8 sps:$4 sm:$0xff]  }
  0xc2   : > { %1874 = vmatpush3.bf16.msra.mxu1 %v2127_v22  ;;  %v2152_v52 = vld [vmem:[%s2741_s4 + $0xf4] ss:$8 sps:$4 sm:$0xff]   ;;  %v2160_v53 = vld [vmem:[%s2734_s21 + $0x20] ss:$8 sps:$4 sm:$0xff]   ;;  %v2154_v55 = vld [vmem:[%s2741_s4 + $0xf0] ss:$8 sps:$4 sm:$0xff]  }
  0xc3   : > { %766 = vmatpush1.bf16.msra.mxu0 %v2102_v13  ;;  %1875 = vmatprep.subr.bf16.mxu1 %v2129_v23  ;;  %v2161_v54 = vld [vmem:[%s2734_s21 + $0x34] ss:$8 sps:$4 sm:$0xff]   ;;  %v2163_v56 = vld [vmem:[%s2734_s21 + $0x30] ss:$8 sps:$4 sm:$0xff]   ;;  %v2164_v57 = vld [vmem:[%s2734_s21 + $0x44] ss:$8 sps:$4 sm:$0xff]  }
  0xc4   : > { %767 = vmatprep.subr.bf16.mxu0 %v2103_v14  ;;  %v2166_v58 = vld [vmem:[%s2734_s21 + $0x40] ss:$8 sps:$4 sm:$0xff]   ;;  %v2167_v59 = vld [vmem:[%s2734_s21 + $0x54] ss:$8 sps:$4 sm:$0xff]   ;;  %v2169_v60 = vld [vmem:[%s2734_s21 + $0x50] ss:$8 sps:$4 sm:$0xff]  }
  0xc5   : > { %v2170_v61 = vld [vmem:[%s2734_s21 + $0x64] ss:$8 sps:$4 sm:$0xff]   ;;  %v2172_v62 = vld [vmem:[%s2734_s21 + $0x60] ss:$8 sps:$4 sm:$0xff]   ;;  %v2173_v63 = vld [vmem:[%s2734_s21 + $0x74] ss:$8 sps:$4 sm:$0xff]  }
  0xc6   : > { %1876 = vmatpush3.bf16.msra.mxu1 %v2132_v26  ;;  %v2175_v0 = vld [vmem:[%s2734_s21 + $0x70] ss:$8 sps:$4 sm:$0xff]   ;;  %v934_v2 = vld [vmem:[#allocation3] sm:$0xff]  ;;  %v935_v6 = vld [vmem:[#allocation3 + $0x8] sm:$0xff] }
  0xc7   : > { %768 = vmatpush1.bf16.msra.mxu0 %v2105_v17  ;;  %1877 = vmatprep.subr.bf16.mxu1 %v2134_v27  ;;  %v936_v12 = vld [vmem:[#allocation3 + $0x10] sm:$0xff]  ;;  %v937_v16 = vld [vmem:[#allocation3 + $0x18] sm:$0xff]  ;;  %v938_v22 = vld [vmem:[#allocation3 + $0x20] sm:$0xff] }
  0xc8   : > { %769 = vmatprep.subr.bf16.mxu0 %v2106_v19  ;;  %v453_v26 = vld [vmem:[#allocation2] sm:$0xff]  ;;  %v939_v27 = vld [vmem:[#allocation3 + $0x28] sm:$0xff] }
  0xca   : > { %1878 = vmatpush3.bf16.msra.mxu1 %v2137_v30 }
  0xcb   : > { %770 = vmatpush1.bf16.msra.mxu0 %v2108_v21  ;;  %1879 = vmatprep.subr.bf16.mxu1 %v2139_v31 }
  0xcc   : > { %771 = vmatprep.subr.bf16.mxu0 %v2110_v24 }
  0xce   : > { %1880 = vmatpush3.bf16.msra.mxu1 %v2142_v33  ;;  %v455_v33 = vld [vmem:[#allocation2 + $0x10] sm:$0xff] }
  0xcf   : > { %772 = vmatpush1.bf16.msra.mxu0 %v2113_v25  ;;  %1881 = vmatprep.subr.bf16.mxu1 %v2144_v35 }
  0xd0   : > { %773 = vmatprep.subr.bf16.mxu0 %v2115_v28 }
  0xd2   : > { %1882 = vmatpush3.bf16.msra.mxu1 %v2147_v38 }
  0xd3   : > { %774 = vmatpush1.bf16.msra.mxu0 %v2118_v29  ;;  %v454_v29 = vld [vmem:[#allocation2 + $0x8] sm:$0xff] }
  0xd4   : > { %775 = vmatprep.subr.bf16.mxu0 %v2120_v32 }
  0xd5   : > { %1111 = vmatmul.mubr.bf16.vlgmr.msra.gmra.mrb[0].mxu1 %v2149_v41 }
  0xd6   : > { %1118 = vmatprep.mubr.bf16.mxu1 %v2155_v42 }
  0xd7   : > { %776 = vmatpush1.bf16.msra.mxu0 %v2123_v34 }
  0xd8   : > { %777 = vmatprep.subr.bf16.mxu0 %v2125_v36  ;;  %v456_v36 = vld [vmem:[#allocation2 + $0x18] sm:$0xff] }
  0xdb   : > { %778 = vmatpush1.bf16.msra.mxu0 %v2128_v39 }
  0xdc   : > { %779 = vmatprep.subr.bf16.mxu0 %v2130_v40 }
  0xdd   : > { %1119 = vmatmul.mubr.bf16.gmra.mrb[4].mxu1 %v2157_v47 }
  0xde   : > { %1126 = vmatprep.mubr.bf16.mxu1 %v2158_v48 }
  0xdf   : > { %780 = vmatpush1.bf16.msra.mxu0 %v2133_v43 }
  0xe0   : > { %781 = vmatprep.subr.bf16.mxu0 %v2135_v44  ;;  %v940_v44 = vld [vmem:[#allocation3 + $0x30] sm:$0xff] }
  0xe3   : > { %782 = vmatpush1.bf16.msra.mxu0 %v2138_v45 }
  0xe4   : > { %783 = vmatprep.subr.bf16.mxu0 %v2140_v46 }
  0xe5   : > { %1127 = vmatmul.mubr.bf16.gmra.mrb[8].mxu1 %v2160_v53 }
  0xe6   : > { %1134 = vmatprep.mubr.bf16.mxu1 %v2161_v54 }
  0xe7   : > { %784 = vmatpush1.bf16.msra.mxu0 %v2143_v49  ;;  %v941_v49 = vld [vmem:[#allocation3 + $0x38] sm:$0xff] }
  0xe8   : > { %785 = vmatprep.subr.bf16.mxu0 %v2145_v50 }
  0xeb   : > { %786 = vmatpush1.bf16.msra.mxu0 %v2148_v51  ;;  %v458_v51 = vld [vmem:[#allocation2 + $0x28] sm:$0xff] }
  0xec   : > { %787 = vmatprep.subr.bf16.mxu0 %v2152_v52 }
  0xed   : > { %1135 = vmatmul.mubr.bf16.gmra.mrb[12].mxu1 %v2163_v56 }
  0xee   : > { %1142 = vmatprep.mubr.bf16.mxu1 %v2164_v57 }
  0xef   : > { %788 = vmatpush1.bf16.msra.mxu0 %v2154_v55  ;;  %v459_v55 = vld [vmem:[#allocation2 + $0x30] sm:$0xff] }
  0xf2   : > { %790 = vmatmul.mubr.bf16.vlgmr.msra.gmra.mrb[0].mxu0 %v2149_v41 }
  0xf3   : > { %799 = vmatprep.mubr.bf16.mxu0 %v2155_v42 }
  0xf5   : > { %1143 = vmatmul.mubr.bf16.gmra.mrb[16].mxu1 %v2166_v58 }
  0xf6   : > { %1150 = vmatprep.mubr.bf16.mxu1 %v2167_v59 }
  0xfa   : > { %800 = vmatmul.mubr.bf16.gmra.mrb[4].mxu0 %v2157_v47 }
  0xfb   : > { %809 = vmatprep.mubr.bf16.mxu0 %v2158_v48  ;;  %v457_v48 = vld [vmem:[#allocation2 + $0x20] sm:$0xff] }
  0xfd   : > { %1151 = vmatmul.mubr.bf16.gmra.mrb[20].mxu1 %v2169_v60 }
  0xfe   : > { %1158 = vmatprep.mubr.bf16.mxu1 %v2170_v61 }
 0x102   : > { %810 = vmatmul.mubr.bf16.gmra.mrb[8].mxu0 %v2160_v53 }
 0x103   : > { %819 = vmatprep.mubr.bf16.mxu0 %v2161_v54 }
 0x105   : > { %1159 = vmatmul.mubr.bf16.gmra.mrb[24].mxu1 %v2172_v62 }
 0x106   : > { %1166 = vmatprep.mubr.bf16.mxu1 %v2173_v63 }
 0x10a   : > { %820 = vmatmul.mubr.bf16.gmra.mrb[12].mxu0 %v2163_v56 }
 0x10b   : > { %829 = vmatprep.mubr.bf16.mxu0 %v2164_v57 }
 0x10d   : > { %1167 = vmatmul.mubr.bf16.gmra.mrb[28].mxu1 %v2175_v0 }
 0x112   : > { %830 = vmatmul.mubr.bf16.gmra.mrb[16].mxu0 %v2166_v58  ;;  %v460_v58 = vld [vmem:[#allocation2 + $0x38] sm:$0xff] }
 0x113   : > { %839 = vmatprep.mubr.bf16.mxu0 %v2167_v59 }
 0x11a   : > { %840 = vmatmul.mubr.bf16.gmra.mrb[20].mxu0 %v2169_v60 }
 0x11b   : > { %849 = vmatprep.mubr.bf16.mxu0 %v2170_v61 }
 0x122   : > { %850 = vmatmul.mubr.bf16.gmra.mrb[24].mxu0 %v2172_v62 }
 0x123   : > { %859 = vmatprep.mubr.bf16.mxu0 %v2173_v63 }
 0x12a   : > { %860 = vmatmul.mubr.bf16.gmra.mrb[28].mxu0 %v2175_v0 }
 0x1a8   : > { %v1883_v1 = vpop.f32.mrb[0].mxu1 }
 0x1a9   : > { %v1884_v3 = vpop.f32.mrb[1].mxu1 }
 0x1aa   : > { %v1885_v4 = vadd.f32 %v1884_v3, %v1883_v1  ;;  %v1886_v5 = vpop.f32.mrb[2].mxu1 }
 0x1ab   : > { %v1887_v7 = vpop.f32.mrb[3].mxu1 }
 0x1ac   : > { %v1175_v8 = vadd.f32 %v1885_v4, %v934_v2  ;;  %v1888_v9 = vadd.f32 %v1887_v7, %v1886_v5  ;;  %v942_v2 = vld [vmem:[#allocation3 + $0x40] sm:$0xff]  ;;  %v943_v7 = vld [vmem:[#allocation3 + $0x48] sm:$0xff] }
 0x1ae   : > { %1192 = vst.msk [vmem:[#allocation3] sm:$0xff] %vm1191_vm1, %v1175_v8  ;;  %v1176_v10 = vadd.f32 %v1888_v9, %v935_v6  ;;  %v461_v6 = vld [vmem:[#allocation2 + $0x40] sm:$0xff]  ;;  %v462_v9 = vld [vmem:[#allocation2 + $0x48] sm:$0xff] }
 0x1b0   : > { %1193 = vst.msk [vmem:[#allocation3 + $0x8] sm:$0xff] %vm1191_vm1, %v1176_v10  ;;  %v1889_v11 = vpop.f32.mrb[4].mxu1 }
 0x1b1   : > { %v1890_v13 = vpop.f32.mrb[5].mxu1 }
 0x1b2   : > { %v1891_v14 = vadd.f32 %v1890_v13, %v1889_v11  ;;  %v1892_v15 = vpop.f32.mrb[6].mxu1  ;;  %v463_v13 = vld [vmem:[#allocation2 + $0x50] sm:$0xff] }
 0x1b3   : > { %v1893_v17 = vpop.f32.mrb[7].mxu1 }
 0x1b4   : > { %v1177_v18 = vadd.f32 %v1891_v14, %v936_v12  ;;  %v1894_v19 = vadd.f32 %v1893_v17, %v1892_v15 }
 0x1b6   : > { %1194 = vst.msk [vmem:[#allocation3 + $0x10] sm:$0xff] %vm1191_vm1, %v1177_v18  ;;  %v1178_v20 = vadd.f32 %v1894_v19, %v937_v16  ;;  %v464_v16 = vld [vmem:[#allocation2 + $0x58] sm:$0xff] }
 0x1b8   : > { %1195 = vst.msk [vmem:[#allocation3 + $0x18] sm:$0xff] %vm1191_vm1, %v1178_v20  ;;  %v1895_v21 = vpop.f32.mrb[8].mxu1 }
 0x1b9   : > { %v1896_v23 = vpop.f32.mrb[9].mxu1 }
 0x1ba   : > { %v1897_v24 = vadd.f32 %v1896_v23, %v1895_v21  ;;  %v1898_v25 = vpop.f32.mrb[10].mxu1 }
 0x1bb   : > { %v1899_v28 = vpop.f32.mrb[11].mxu1 }
 0x1bc   : > { %v1179_v30 = vadd.f32 %v1897_v24, %v938_v22  ;;  %v1900_v31 = vadd.f32 %v1899_v28, %v1898_v25  ;;  %v944_v24 = vld [vmem:[#allocation3 + $0x50] sm:$0xff]  ;;  %v465_v28 = vld [vmem:[#allocation2 + $0x60] sm:$0xff] }
 0x1be   : > { %1196 = vst.msk [vmem:[#allocation3 + $0x20] sm:$0xff] %vm1191_vm1, %v1179_v30  ;;  %v1180_v37 = vadd.f32 %v1900_v31, %v939_v27  ;;  %v466_v31 = vld [vmem:[#allocation2 + $0x68] sm:$0xff] }
 0x1c0   : > { %1197 = vst.msk [vmem:[#allocation3 + $0x28] sm:$0xff] %vm1191_vm1, %v1180_v37  ;;  %v1901_v42 = vpop.f32.mrb[12].mxu1 }
 0x1c1   : > { %v1902_v45 = vpop.f32.mrb[13].mxu1 }
 0x1c2   : > { %v1903_v46 = vadd.f32 %v1902_v45, %v1901_v42  ;;  %v1904_v47 = vpop.f32.mrb[14].mxu1 }
 0x1c3   : > { %v1905_v50 = vpop.f32.mrb[15].mxu1 }
 0x1c4   : > { %v1181_v52 = vadd.f32 %v1903_v46, %v940_v44  ;;  %v1906_v53 = vadd.f32 %v1905_v50, %v1904_v47  ;;  %v946_v46 = vld [vmem:[#allocation3 + $0x60] sm:$0xff] }
 0x1c5   : > { %v791_v32 = vpop.f32.mrb[0].mxu0  ;;  %v469_v50 = vld [vmem:[#allocation2 + $0x80] sm:$0xff] }
 0x1c6   : > { %v870_v34 = vadd.f32 %v791_v32, %v453_v26  ;;  %v793_v35 = vpop.f32.mrb[1].mxu0  ;;  %1198 = vst.msk [vmem:[#allocation3 + $0x30] sm:$0xff] %vm1191_vm1, %v1181_v52  ;;  %v1182_v59 = vadd.f32 %v1906_v53, %v941_v49  ;;  %v470_v53 = vld [vmem:[#allocation2 + $0x88] sm:$0xff] }
 0x1c7   : > { %v871_v38 = vadd.f32 %v793_v35, %v454_v29  ;;  %v795_v39 = vpop.f32.mrb[2].mxu0  ;;  %v945_v29 = vld [vmem:[#allocation3 + $0x58] sm:$0xff]  ;;  %v467_v35 = vld [vmem:[#allocation2 + $0x70] sm:$0xff] }
 0x1c8   : > { %902 = vst [vmem:[#allocation2] sm:$0xff] %v870_v34  ;;  %v872_v40 = vadd.f32 %v795_v39, %v455_v33  ;;  %v797_v41 = vpop.f32.mrb[3].mxu0  ;;  %1199 = vst.msk [vmem:[#allocation3 + $0x38] sm:$0xff] %vm1191_vm1, %v1182_v59  ;;  %v1907_v0 = vpop.f32.mrb[16].mxu1 }
 0x1c9   : > { %903 = vst [vmem:[#allocation2 + $0x8] sm:$0xff] %v871_v38  ;;  %v873_v43 = vadd.f32 %v797_v41, %v456_v36  ;;  %v1908_v3 = vpop.f32.mrb[17].mxu1  ;;  %v468_v38 = vld [vmem:[#allocation2 + $0x78] sm:$0xff] }
 0x1ca   : > { %904 = vst [vmem:[#allocation2 + $0x10] sm:$0xff] %v872_v40  ;;  %v1909_v4 = vadd.f32 %v1908_v3, %v1907_v0  ;;  %v1910_v5 = vpop.f32.mrb[18].mxu1 }
 0x1cb   : > { %905 = vst [vmem:[#allocation2 + $0x18] sm:$0xff] %v873_v43  ;;  %v1911_v8 = vpop.f32.mrb[19].mxu1 }
 0x1cc   : > { %v1183_v10 = vadd.f32 %v1909_v4, %v942_v2  ;;  %v1912_v11 = vadd.f32 %v1911_v8, %v1910_v5  ;;  %v948_v4 = vld [vmem:[#allocation3 + $0x70] sm:$0xff]  ;;  %v473_v8 = vld [vmem:[#allocation2 + $0xa0] sm:$0xff] }
 0x1cd   : > { %v801_v54 = vpop.f32.mrb[4].mxu0 }
 0x1ce   : > { %v874_v56 = vadd.f32 %v801_v54, %v457_v48  ;;  %v803_v57 = vpop.f32.mrb[5].mxu0  ;;  %1200 = vst.msk [vmem:[#allocation3 + $0x40] sm:$0xff] %vm1191_vm1, %v1183_v10  ;;  %v1184_v17 = vadd.f32 %v1912_v11, %v943_v7  ;;  %v474_v11 = vld [vmem:[#allocation2 + $0xa8] sm:$0xff] }
 0x1cf   : > { %v875_v60 = vadd.f32 %v803_v57, %v458_v51  ;;  %v805_v61 = vpop.f32.mrb[6].mxu0  ;;  %v947_v51 = vld [vmem:[#allocation3 + $0x68] sm:$0xff]  ;;  %v471_v57 = vld [vmem:[#allocation2 + $0x90] sm:$0xff] }
 0x1d0   : > { %906 = vst [vmem:[#allocation2 + $0x20] sm:$0xff] %v874_v56  ;;  %v876_v62 = vadd.f32 %v805_v61, %v459_v55  ;;  %v807_v63 = vpop.f32.mrb[7].mxu0  ;;  %1201 = vst.msk [vmem:[#allocation3 + $0x48] sm:$0xff] %vm1191_vm1, %v1184_v17  ;;  %v1913_v22 = vpop.f32.mrb[20].mxu1 }
 0x1d1   : > { %907 = vst [vmem:[#allocation2 + $0x28] sm:$0xff] %v875_v60  ;;  %v877_v1 = vadd.f32 %v807_v63, %v460_v58  ;;  %v1914_v25 = vpop.f32.mrb[21].mxu1  ;;  %v472_v60 = vld [vmem:[#allocation2 + $0x98] sm:$0xff] }
 0x1d2   : > { %908 = vst [vmem:[#allocation2 + $0x30] sm:$0xff] %v876_v62  ;;  %v1915_v26 = vadd.f32 %v1914_v25, %v1913_v22  ;;  %v1916_v27 = vpop.f32.mrb[22].mxu1  ;;  %v477_v25 = vld [vmem:[#allocation2 + $0xc0] sm:$0xff] }
 0x1d3   : > { %909 = vst [vmem:[#allocation2 + $0x38] sm:$0xff] %v877_v1  ;;  %v1917_v30 = vpop.f32.mrb[23].mxu1 }
 0x1d4   : > { %v1185_v32 = vadd.f32 %v1915_v26, %v944_v24  ;;  %v1918_v33 = vadd.f32 %v1917_v30, %v1916_v27  ;;  %v478_v26 = vld [vmem:[#allocation2 + $0xc8] sm:$0xff] }
 0x1d5   : > { %v811_v12 = vpop.f32.mrb[8].mxu0 }
 0x1d6   : > { %v878_v14 = vadd.f32 %v811_v12, %v461_v6  ;;  %v813_v15 = vpop.f32.mrb[9].mxu0  ;;  %1202 = vst.msk [vmem:[#allocation3 + $0x50] sm:$0xff] %vm1191_vm1, %v1185_v32  ;;  %v1186_v39 = vadd.f32 %v1918_v33, %v945_v29 }
 0x1d7   : > { %v879_v18 = vadd.f32 %v813_v15, %v462_v9  ;;  %v815_v19 = vpop.f32.mrb[10].mxu0  ;;  %v949_v9 = vld [vmem:[#allocation3 + $0x78] sm:$0xff]  ;;  %v475_v15 = vld [vmem:[#allocation2 + $0xb0] sm:$0xff] }
 0x1d8   : > { %910 = vst [vmem:[#allocation2 + $0x40] sm:$0xff] %v878_v14  ;;  %v880_v20 = vadd.f32 %v815_v19, %v463_v13  ;;  %v817_v21 = vpop.f32.mrb[11].mxu0  ;;  %1203 = vst.msk [vmem:[#allocation3 + $0x58] sm:$0xff] %vm1191_vm1, %v1186_v39  ;;  %v1919_v44 = vpop.f32.mrb[24].mxu1 }
 0x1d9   : > { %911 = vst [vmem:[#allocation2 + $0x48] sm:$0xff] %v879_v18  ;;  %v881_v23 = vadd.f32 %v817_v21, %v464_v16  ;;  %v1920_v47 = vpop.f32.mrb[25].mxu1  ;;  %v476_v18 = vld [vmem:[#allocation2 + $0xb8] sm:$0xff] }
 0x1da   : > { %912 = vst [vmem:[#allocation2 + $0x50] sm:$0xff] %v880_v20  ;;  %v1921_v48 = vadd.f32 %v1920_v47, %v1919_v44  ;;  %v1922_v49 = vpop.f32.mrb[26].mxu1 }
 0x1db   : > { %913 = vst [vmem:[#allocation2 + $0x58] sm:$0xff] %v881_v23  ;;  %v1923_v52 = vpop.f32.mrb[27].mxu1 }
 0x1dc   : > { %v1187_v54 = vadd.f32 %v1921_v48, %v946_v46  ;;  %v1924_v55 = vadd.f32 %v1923_v52, %v1922_v49  ;;  %v1228_v49 = vld [vmem:[%s2766_s6] sm:$0xff] (!%p1840_p1)  ;;  %v2410_v52 = vmov (!%p1840_p1), 0.0  }
 0x1dd   : > { %v821_v34 = vpop.f32.mrb[12].mxu0  ;;  %1343 = vmatprep.mubr.f32.mxu0 (!%p1840_p1), %v2410_v52  ;;  %1391 = vmatprep.mubr.f32.mxu1 (!%p1840_p1), %v2410_v52 }
 0x1de   : > { %v882_v36 = vadd.f32 %v821_v34, %v465_v28  ;;  %v823_v37 = vpop.f32.mrb[13].mxu0  ;;  %1204 = vst.msk [vmem:[#allocation3 + $0x60] sm:$0xff] %vm1191_vm1, %v1187_v54  ;;  %v1188_v61 = vadd.f32 %v1924_v55, %v947_v51  ;;  %v479_v28 = vld [vmem:[#allocation2 + $0xd0] sm:$0xff]  ;;  %v1229_v51 = vunpack.c.l.bf16 (!%p1840_p1), %v1228_v49  ;;  %v1220_v54 = vld [vmem:[#allocation3 + $0x40] sm:$0xff] (!%p1840_p1)  ;;  %v1213_v55 = vld [vmem:[#allocation3 + $0x8] sm:$0xff] (!%p1840_p1) }
 0x1df   : > { %v883_v40 = vadd.f32 %v823_v37, %v466_v31  ;;  %v825_v41 = vpop.f32.mrb[14].mxu0  ;;  %v480_v31 = vld [vmem:[#allocation2 + $0xd8] sm:$0xff]  ;;  %v481_v37 = vld [vmem:[#allocation2 + $0xe0] sm:$0xff] }
 0x1e0   : > { %914 = vst [vmem:[#allocation2 + $0x60] sm:$0xff] %v882_v36  ;;  %v884_v42 = vadd.f32 %v825_v41, %v467_v35  ;;  %v827_v43 = vpop.f32.mrb[15].mxu0  ;;  %1205 = vst.msk [vmem:[#allocation3 + $0x68] sm:$0xff] %vm1191_vm1, %v1188_v61  ;;  %v1925_v2 = vpop.f32.mrb[28].mxu1  ;;  %v1216_v61 = vld [vmem:[#allocation3 + $0x20] sm:$0xff] (!%p1840_p1) }
 0x1e1   : > { %915 = vst [vmem:[#allocation2 + $0x68] sm:$0xff] %v883_v40  ;;  %v885_v45 = vadd.f32 %v827_v43, %v468_v38  ;;  %v1926_v5 = vpop.f32.mrb[29].mxu1  ;;  %v482_v38 = vld [vmem:[#allocation2 + $0xe8] sm:$0xff]  ;;  %v483_v40 = vld [vmem:[#allocation2 + $0xf0] sm:$0xff]  ;;  %v484_v43 = vld [vmem:[#allocation2 + $0xf8] sm:$0xff] }
 0x1e2   : > { %916 = vst [vmem:[#allocation2 + $0x70] sm:$0xff] %v884_v42  ;;  %v1927_v6 = vadd.f32 %v1926_v5, %v1925_v2  ;;  %v1928_v7 = vpop.f32.mrb[30].mxu1  ;;  %v1506_v5 = vlaneseq (!%p1840_p1) }
 0x1e3   : > { %917 = vst [vmem:[#allocation2 + $0x78] sm:$0xff] %v885_v45  ;;  %v1929_v10 = vpop.f32.mrb[31].mxu1 }
 0x1e4   : > { %v1189_v12 = vadd.f32 %v1927_v6, %v948_v4  ;;  %v1930_v13 = vadd.f32 %v1929_v10, %v1928_v7  ;;  %v1507_v6 = vshrl.u32 (!%p1840_p1), %v1506_v5, 7  ;;  %v1440_v10 = vld [vmem:[#allocation2] sm:$0xff] (!%p1840_p1) }
 0x1e5   : > { %v831_v56 = vpop.f32.mrb[16].mxu0 }
 0x1e6   : > { %v886_v58 = vadd.f32 %v831_v56, %v469_v50  ;;  %v833_v59 = vpop.f32.mrb[17].mxu0  ;;  %1206 = vst.msk [vmem:[#allocation3 + $0x70] sm:$0xff] %vm1191_vm1, %v1189_v12  ;;  %v1190_v19 = vadd.f32 %v1930_v13, %v949_v9  ;;  %v1230_v50 = vunpack.c.h.bf16 (!%p1840_p1), %v1228_v49  ;;  %v1221_v56 = vld [vmem:[#allocation3 + $0x48] sm:$0xff] (!%p1840_p1)  ;;  %v1508_v7 = vsub.s32 (!%p1840_p1), 0, %v1507_v6 }
 0x1e7   : > { %v887_v62 = vadd.f32 %v833_v59, %v470_v53  ;;  %v835_v63 = vpop.f32.mrb[18].mxu0  ;;  %v1212_v53 = vld [vmem:[#allocation3] sm:$0xff] (!%p1840_p1)  ;;  %v1215_v59 = vld [vmem:[#allocation3 + $0x18] sm:$0xff] (!%p1840_p1)  ;;  %v1512_v9 = vsub.s32 (!%p1840_p1), 1, %v1507_v6  ;;  %v1441_v13 = vld [vmem:[#allocation2 + $0x8] sm:$0xff] (!%p1840_p1) }
 0x1e8   : > { %918 = vst [vmem:[#allocation2 + $0x80] sm:$0xff] %v886_v58  ;;  %v888_v0 = vadd.f32 %v835_v63, %v471_v57  ;;  %v837_v1 = vpop.f32.mrb[19].mxu0  ;;  %1207 = vst.msk [vmem:[#allocation3 + $0x78] sm:$0xff] %vm1191_vm1, %v1190_v19  ;;  %1279 = vmatprep.subr.mxu0 (!%p1840_p1), %v1230_v50  ;;  %1931 = vmatprep.subr.mxu1 (!%p1840_p1), %v1230_v50  ;;  %v1214_v57 = vld [vmem:[#allocation3 + $0x10] sm:$0xff] (!%p1840_p1)  ;;  %v1217_v63 = vld [vmem:[#allocation3 + $0x28] sm:$0xff] (!%p1840_p1) }
 0x1e9   : > { %919 = vst [vmem:[#allocation2 + $0x88] sm:$0xff] %v887_v62  ;;  %v889_v3 = vadd.f32 %v837_v1, %v472_v60  ;;  %1280 = vmatpush1.msra.mxu0 (!%p1840_p1), %v1229_v51  ;;  %1932 = vmatpush1.msra.mxu1 (!%p1840_p1), %v1229_v51  ;;  %v1222_v58 = vld [vmem:[#allocation3 + $0x50] sm:$0xff] (!%p1840_p1)  ;;  %v1223_v60 = vld [vmem:[#allocation3 + $0x58] sm:$0xff] (!%p1840_p1)  ;;  %v1224_v62 = vld [vmem:[#allocation3 + $0x60] sm:$0xff] (!%p1840_p1) }
 0x1ea   : > { %920 = vst [vmem:[#allocation2 + $0x90] sm:$0xff] %v888_v0  ;;  %1841 = vmatmul.mubr.msk.f32.vlgmr.msra.gmra.mrb[0].mxu0 (!%p1840_p1), %vm1191_vm1, %v1212_v53  ;;  %1849 = vmatmul.mubr.msk.f32.vlgmr.msra.gmra.mrb[0].mxu1 (!%p1840_p1), %vm1191_vm1, %v1220_v54  ;;  %v1225_v0 = vld [vmem:[#allocation3 + $0x68] sm:$0xff] (!%p1840_p1)  ;;  %v1218_v1 = vld [vmem:[#allocation3 + $0x30] sm:$0xff] (!%p1840_p1) }
 0x1eb   : > { %921 = vst [vmem:[#allocation2 + $0x98] sm:$0xff] %v889_v3  ;;  %1349 = vmatprep.mubr.f32.mxu0 (!%p1840_p1), %v2410_v52  ;;  %1397 = vmatprep.mubr.f32.mxu1 (!%p1840_p1), %v2410_v52  ;;  %v1219_v3 = vld [vmem:[#allocation3 + $0x38] sm:$0xff] (!%p1840_p1) }
 0x1ed   : > { %v841_v14 = vpop.f32.mrb[20].mxu0  ;;  %v1226_v2 = vld [vmem:[#allocation3 + $0x70] sm:$0xff] (!%p1840_p1) }
 0x1ee   : > { %v890_v16 = vadd.f32 %v841_v14, %v473_v8  ;;  %v843_v17 = vpop.f32.mrb[21].mxu0  ;;  %1842 = vmatmul.mubr.msk.f32.gmra.mrb[2].mxu0 (!%p1840_p1), %vm1191_vm1, %v1213_v55  ;;  %1850 = vmatmul.mubr.msk.f32.gmra.mrb[2].mxu1 (!%p1840_p1), %vm1191_vm1, %v1221_v56  ;;  %v1504_v8 = vld [vmem:[%s367_s10] sm:$0x3] (!%p1840_p1)  ;;  %v1446_v56 = vld [vmem:[#allocation2 + $0x30] sm:$0xff] (!%p1840_p1) }
 0x1ef   : > { %v891_v20 = vadd.f32 %v843_v17, %v474_v11  ;;  %v845_v21 = vpop.f32.mrb[22].mxu0  ;;  %1355 = vmatprep.mubr.f32.mxu0 (!%p1840_p1), %v2410_v52  ;;  %1403 = vmatprep.mubr.f32.mxu1 (!%p1840_p1), %v2410_v52  ;;  %v1227_v4 = vld [vmem:[#allocation3 + $0x78] sm:$0xff] (!%p1840_p1)  ;;  %v1456_v11 = vld [vmem:[#allocation2 + $0x80] sm:$0xff] (!%p1840_p1)  ;;  %v2895_v12 = vrot.slane (!%p1840_p1), %v1504_v8, %v1508_v7  ;;  %v2897_v17 = vrot.slane (!%p1840_p1), %v1504_v8, %v1512_v9 }
 0x1f0   : > { %922 = vst [vmem:[#allocation2 + $0xa0] sm:$0xff] %v890_v16  ;;  %v892_v22 = vadd.f32 %v845_v21, %v475_v15  ;;  %v847_v23 = vpop.f32.mrb[23].mxu0  ;;  %v1457_v14 = vld [vmem:[#allocation2 + $0x88] sm:$0xff] (!%p1840_p1)  ;;  %v1448_v8 = vld [vmem:[#allocation2 + $0x40] sm:$0xff] (!%p1840_p1) }
 0x1f1   : > { %923 = vst [vmem:[#allocation2 + $0xa8] sm:$0xff] %v891_v20  ;;  %v893_v24 = vadd.f32 %v847_v23, %v476_v18 }
 0x1f2   : > { %924 = vst [vmem:[#allocation2 + $0xb0] sm:$0xff] %v892_v22  ;;  %1843 = vmatmul.mubr.msk.f32.gmra.mrb[4].mxu0 (!%p1840_p1), %vm1191_vm1, %v1214_v57  ;;  %1851 = vmatmul.mubr.msk.f32.gmra.mrb[4].mxu1 (!%p1840_p1), %vm1191_vm1, %v1222_v58 }
 0x1f3   : > { %925 = vst [vmem:[#allocation2 + $0xb8] sm:$0xff] %v893_v24  ;;  %1361 = vmatprep.mubr.f32.mxu0 (!%p1840_p1), %v2410_v52  ;;  %1409 = vmatprep.mubr.f32.mxu1 (!%p1840_p1), %v2410_v52  ;;  %v1442_v24 = vld [vmem:[#allocation2 + $0x10] sm:$0xff] (!%p1840_p1) }
 0x1f5   : > { %v851_v27 = vpop.f32.mrb[24].mxu0 }
 0x1f6   : > { %v894_v29 = vadd.f32 %v851_v27, %v477_v25  ;;  %v853_v30 = vpop.f32.mrb[25].mxu0  ;;  %1844 = vmatmul.mubr.msk.f32.gmra.mrb[6].mxu0 (!%p1840_p1), %vm1191_vm1, %v1215_v59  ;;  %1852 = vmatmul.mubr.msk.f32.gmra.mrb[6].mxu1 (!%p1840_p1), %vm1191_vm1, %v1223_v60  ;;  %v1458_v25 = vld [vmem:[#allocation2 + $0x90] sm:$0xff] (!%p1840_p1)  ;;  %v1447_v60 = vld [vmem:[#allocation2 + $0x38] sm:$0xff] (!%p1840_p1) }
 0x1f7   : > { %v895_v32 = vadd.f32 %v853_v30, %v478_v26  ;;  %v855_v33 = vpop.f32.mrb[26].mxu0  ;;  %1367 = vmatprep.mubr.f32.mxu0 (!%p1840_p1), %v2410_v52  ;;  %1415 = vmatprep.mubr.f32.mxu1 (!%p1840_p1), %v2410_v52 }
 0x1f8   : > { %926 = vst [vmem:[#allocation2 + $0xc0] sm:$0xff] %v894_v29  ;;  %v896_v34 = vadd.f32 %v855_v33, %v479_v28  ;;  %v857_v35 = vpop.f32.mrb[27].mxu0  ;;  %v1443_v28 = vld [vmem:[#allocation2 + $0x18] sm:$0xff] (!%p1840_p1) }
 0x1f9   : > { %927 = vst [vmem:[#allocation2 + $0xc8] sm:$0xff] %v895_v32  ;;  %v897_v36 = vadd.f32 %v857_v35, %v480_v31  ;;  %v1459_v29 = vld [vmem:[#allocation2 + $0x98] sm:$0xff] (!%p1840_p1)  ;;  %v1462_v57 = vld [vmem:[#allocation2 + $0xb0] sm:$0xff] (!%p1840_p1) }
 0x1fa   : > { %928 = vst [vmem:[#allocation2 + $0xd0] sm:$0xff] %v896_v34  ;;  %1845 = vmatmul.mubr.msk.f32.gmra.mrb[8].mxu0 (!%p1840_p1), %vm1191_vm1, %v1216_v61  ;;  %1853 = vmatmul.mubr.msk.f32.gmra.mrb[8].mxu1 (!%p1840_p1), %vm1191_vm1, %v1224_v62  ;;  %v1463_v61 = vld [vmem:[#allocation2 + $0xb8] sm:$0xff] (!%p1840_p1) }
 0x1fb   : > { %929 = vst [vmem:[#allocation2 + $0xd8] sm:$0xff] %v897_v36  ;;  %1373 = vmatprep.mubr.f32.mxu0 (!%p1840_p1), %v2410_v52  ;;  %1421 = vmatprep.mubr.f32.mxu1 (!%p1840_p1), %v2410_v52 }
 0x1fd   : > { %v861_v39 = vpop.f32.mrb[28].mxu0  ;;  %1211 = sbr.rel (%p1840_p1) target bundleno = 736 (0x2e0), region = 56 }
 0x1fe   : > { %v898_v41 = vadd.f32 %v861_v39, %v481_v37  ;;  %v863_v42 = vpop.f32.mrb[29].mxu0  ;;  %1846 = vmatmul.mubr.msk.f32.gmra.mrb[10].mxu0 (!%p1840_p1), %vm1191_vm1, %v1217_v63  ;;  %1854 = vmatmul.mubr.msk.f32.gmra.mrb[10].mxu1 (!%p1840_p1), %vm1191_vm1, %v1225_v0 }
 0x1ff   : > { %v899_v44 = vadd.f32 %v863_v42, %v482_v38  ;;  %v865_v45 = vpop.f32.mrb[30].mxu0  ;;  %1379 = vmatprep.mubr.f32.mxu0 (!%p1840_p1), %v2410_v52  ;;  %1427 = vmatprep.mubr.f32.mxu1 (!%p1840_p1), %v2410_v52  ;;  %v1464_v9 = vld [vmem:[#allocation2 + $0xc0] sm:$0xff] (!%p1840_p1) }
 0x200   : > { %930 = vst [vmem:[#allocation2 + $0xe0] sm:$0xff] %v898_v41  ;;  %v900_v46 = vadd.f32 %v865_v45, %v483_v40  ;;  %v867_v47 = vpop.f32.mrb[31].mxu0  ;;  %v1444_v40 = vld [vmem:[#allocation2 + $0x20] sm:$0xff] (!%p1840_p1)  ;;  %v1461_v45 = vld [vmem:[#allocation2 + $0xa8] sm:$0xff] (!%p1840_p1) }
 0x201   : > { %931 = vst [vmem:[#allocation2 + $0xe8] sm:$0xff] %v899_v44  ;;  %v901_v48 = vadd.f32 %v867_v47, %v484_v43  ;;  %v1460_v41 = vld [vmem:[#allocation2 + $0xa0] sm:$0xff] (!%p1840_p1)  ;;  %v1445_v44 = vld [vmem:[#allocation2 + $0x28] sm:$0xff] (!%p1840_p1) }
 0x202   : > { %932 = vst [vmem:[#allocation2 + $0xf0] sm:$0xff] %v900_v46  ;;  %1847 = vmatmul.mubr.msk.f32.gmra.mrb[12].mxu0 (!%p1840_p1), %vm1191_vm1, %v1218_v1  ;;  %1855 = vmatmul.mubr.msk.f32.gmra.mrb[12].mxu1 (!%p1840_p1), %vm1191_vm1, %v1226_v2 }
 0x203   : > { %933 = vst [vmem:[#allocation2 + $0xf8] sm:$0xff] %v901_v48  ;;  %1385 = vmatprep.mubr.f32.mxu0 (!%p1840_p1), %v2410_v52  ;;  %1433 = vmatprep.mubr.f32.mxu1 (!%p1840_p1), %v2410_v52 }
 0x206   : > { %1848 = vmatmul.mubr.msk.f32.gmra.mrb[14].mxu0 %vm1191_vm1, %v1219_v3  ;;  %1856 = vmatmul.mubr.msk.f32.gmra.mrb[14].mxu1 %vm1191_vm1, %v1227_v4 }
 0x2bd   : > { %v1345_v15 = vpop.f32.mrb[0].mxu0  ;;  %v1393_v16 = vpop.f32.mrb[0].mxu1 }
 0x2be   : > { %v1472_v18 = vadd.f32 %v1440_v10, %v1345_v15  ;;  %v1488_v19 = vadd.f32 %v1456_v11, %v1393_v16  ;;  %v1347_v20 = vpop.f32.mrb[1].mxu0  ;;  %v1395_v21 = vpop.f32.mrb[1].mxu1 }
 0x2bf   : > { %v1473_v22 = vadd.f32 %v1441_v13, %v1347_v20  ;;  %v1489_v23 = vadd.f32 %v1457_v14, %v1395_v21  ;;  %v1449_v13 = vld [vmem:[#allocation2 + $0x48] sm:$0xff] }
 0x2c0   : > { %v1516_v26 = vadd.f32 %v2895_v12, %v1472_v18  ;;  %v1532_v27 = vadd.f32 %v2895_v12, %v1488_v19  ;;  %v1465_v14 = vld [vmem:[#allocation2 + $0xc8] sm:$0xff] }
 0x2c1   : > { %v1517_v30 = vadd.f32 %v2897_v17, %v1473_v22  ;;  %v1533_v31 = vadd.f32 %v2897_v17, %v1489_v23  ;;  %v1351_v32 = vpop.f32.mrb[2].mxu0  ;;  %v1399_v33 = vpop.f32.mrb[2].mxu1 }
 0x2c2   : > { %1548 = vst [vmem:[%s2773_s16] sm:$0xff] %v1516_v26  ;;  %1564 = vst [vmem:[%s2773_s16 + $0x80] sm:$0xff] %v1532_v27  ;;  %v1474_v34 = vadd.f32 %v1442_v24, %v1351_v32  ;;  %v1490_v35 = vadd.f32 %v1458_v25, %v1399_v33  ;;  %v1353_v36 = vpop.f32.mrb[3].mxu0  ;;  %v1401_v37 = vpop.f32.mrb[3].mxu1  ;;  %v1450_v26 = vld [vmem:[#allocation2 + $0x50] sm:$0xff] }
 0x2c3   : > { %1549 = vst [vmem:[%s2773_s16 + $0x8] sm:$0xff] %v1517_v30  ;;  %1565 = vst [vmem:[%s2773_s16 + $0x88] sm:$0xff] %v1533_v31  ;;  %v1475_v38 = vadd.f32 %v1443_v28, %v1353_v36  ;;  %v1491_v39 = vadd.f32 %v1459_v29, %v1401_v37  ;;  %v1466_v27 = vld [vmem:[#allocation2 + $0xd0] sm:$0xff]  ;;  %v1451_v30 = vld [vmem:[#allocation2 + $0x58] sm:$0xff] }
 0x2c4   : > { %v1518_v42 = vadd.f32 %v2895_v12, %v1474_v34  ;;  %v1534_v43 = vadd.f32 %v2895_v12, %v1490_v35  ;;  %v1467_v31 = vld [vmem:[#allocation2 + $0xd8] sm:$0xff] }
 0x2c5   : > { %v1519_v46 = vadd.f32 %v2897_v17, %v1475_v38  ;;  %v1535_v47 = vadd.f32 %v2897_v17, %v1491_v39  ;;  %v1357_v48 = vpop.f32.mrb[4].mxu0  ;;  %v1405_v49 = vpop.f32.mrb[4].mxu1 }
 0x2c6   : > { %1550 = vst [vmem:[%s2773_s16 + $0x10] sm:$0xff] %v1518_v42  ;;  %1566 = vst [vmem:[%s2773_s16 + $0x90] sm:$0xff] %v1534_v43  ;;  %v1476_v50 = vadd.f32 %v1444_v40, %v1357_v48  ;;  %v1492_v51 = vadd.f32 %v1460_v41, %v1405_v49  ;;  %v1359_v52 = vpop.f32.mrb[5].mxu0  ;;  %v1407_v53 = vpop.f32.mrb[5].mxu1  ;;  %v1452_v42 = vld [vmem:[#allocation2 + $0x60] sm:$0xff] }
 0x2c7   : > { %1551 = vst [vmem:[%s2773_s16 + $0x18] sm:$0xff] %v1519_v46  ;;  %1567 = vst [vmem:[%s2773_s16 + $0x98] sm:$0xff] %v1535_v47  ;;  %v1477_v54 = vadd.f32 %v1445_v44, %v1359_v52  ;;  %v1493_v55 = vadd.f32 %v1461_v45, %v1407_v53  ;;  %v1468_v43 = vld [vmem:[#allocation2 + $0xe0] sm:$0xff]  ;;  %v1453_v46 = vld [vmem:[#allocation2 + $0x68] sm:$0xff] }
 0x2c8   : > { %v1520_v58 = vadd.f32 %v2895_v12, %v1476_v50  ;;  %v1536_v59 = vadd.f32 %v2895_v12, %v1492_v51  ;;  %v1469_v47 = vld [vmem:[#allocation2 + $0xe8] sm:$0xff] }
 0x2c9   : > { %v1521_v62 = vadd.f32 %v2897_v17, %v1477_v54  ;;  %v1537_v63 = vadd.f32 %v2897_v17, %v1493_v55  ;;  %v1363_v0 = vpop.f32.mrb[6].mxu0  ;;  %v1411_v1 = vpop.f32.mrb[6].mxu1 }
 0x2ca   : > { %1552 = vst [vmem:[%s2773_s16 + $0x20] sm:$0xff] %v1520_v58  ;;  %1568 = vst [vmem:[%s2773_s16 + $0xa0] sm:$0xff] %v1536_v59  ;;  %v1478_v2 = vadd.f32 %v1446_v56, %v1363_v0  ;;  %v1494_v3 = vadd.f32 %v1462_v57, %v1411_v1  ;;  %v1365_v4 = vpop.f32.mrb[7].mxu0  ;;  %v1413_v5 = vpop.f32.mrb[7].mxu1  ;;  %v1454_v58 = vld [vmem:[#allocation2 + $0x70] sm:$0xff] }
 0x2cb   : > { %1553 = vst [vmem:[%s2773_s16 + $0x28] sm:$0xff] %v1521_v62  ;;  %1569 = vst [vmem:[%s2773_s16 + $0xa8] sm:$0xff] %v1537_v63  ;;  %v1479_v6 = vadd.f32 %v1447_v60, %v1365_v4  ;;  %v1495_v7 = vadd.f32 %v1463_v61, %v1413_v5  ;;  %v1470_v59 = vld [vmem:[#allocation2 + $0xf0] sm:$0xff]  ;;  %v1455_v62 = vld [vmem:[#allocation2 + $0x78] sm:$0xff] }
 0x2cc   : > { %v1522_v10 = vadd.f32 %v2895_v12, %v1478_v2  ;;  %v1538_v11 = vadd.f32 %v2895_v12, %v1494_v3  ;;  %v1471_v63 = vld [vmem:[#allocation2 + $0xf8] sm:$0xff] }
 0x2cd   : > { %v1523_v15 = vadd.f32 %v2897_v17, %v1479_v6  ;;  %v1539_v16 = vadd.f32 %v2897_v17, %v1495_v7  ;;  %v1369_v18 = vpop.f32.mrb[8].mxu0  ;;  %v1417_v19 = vpop.f32.mrb[8].mxu1 }
 0x2ce   : > { %1554 = vst [vmem:[%s2773_s16 + $0x30] sm:$0xff] %v1522_v10  ;;  %1570 = vst [vmem:[%s2773_s16 + $0xb0] sm:$0xff] %v1538_v11  ;;  %v1480_v20 = vadd.f32 %v1448_v8, %v1369_v18  ;;  %v1496_v21 = vadd.f32 %v1464_v9, %v1417_v19  ;;  %v1371_v22 = vpop.f32.mrb[9].mxu0  ;;  %v1419_v23 = vpop.f32.mrb[9].mxu1 }
 0x2cf   : > { %1555 = vst [vmem:[%s2773_s16 + $0x38] sm:$0xff] %v1523_v15  ;;  %1571 = vst [vmem:[%s2773_s16 + $0xb8] sm:$0xff] %v1539_v16  ;;  %v1481_v24 = vadd.f32 %v1449_v13, %v1371_v22  ;;  %v1497_v25 = vadd.f32 %v1465_v14, %v1419_v23 }
 0x2d0   : > { %v1524_v28 = vadd.f32 %v2895_v12, %v1480_v20  ;;  %v1540_v29 = vadd.f32 %v2895_v12, %v1496_v21 }
 0x2d1   : > { %v1525_v32 = vadd.f32 %v2897_v17, %v1481_v24  ;;  %v1541_v33 = vadd.f32 %v2897_v17, %v1497_v25  ;;  %v1375_v34 = vpop.f32.mrb[10].mxu0  ;;  %v1423_v35 = vpop.f32.mrb[10].mxu1 }
 0x2d2   : > { %1556 = vst [vmem:[%s2773_s16 + $0x40] sm:$0xff] %v1524_v28  ;;  %1572 = vst [vmem:[%s2773_s16 + $0xc0] sm:$0xff] %v1540_v29  ;;  %v1482_v36 = vadd.f32 %v1450_v26, %v1375_v34  ;;  %v1498_v37 = vadd.f32 %v1466_v27, %v1423_v35  ;;  %v1377_v38 = vpop.f32.mrb[11].mxu0  ;;  %v1425_v39 = vpop.f32.mrb[11].mxu1 }
 0x2d3   : > { %1557 = vst [vmem:[%s2773_s16 + $0x48] sm:$0xff] %v1525_v32  ;;  %1573 = vst [vmem:[%s2773_s16 + $0xc8] sm:$0xff] %v1541_v33  ;;  %v1483_v40 = vadd.f32 %v1451_v30, %v1377_v38  ;;  %v1499_v41 = vadd.f32 %v1467_v31, %v1425_v39 }
 0x2d4   : > { %v1526_v44 = vadd.f32 %v2895_v12, %v1482_v36  ;;  %v1542_v45 = vadd.f32 %v2895_v12, %v1498_v37 }
 0x2d5   : > { %v1527_v48 = vadd.f32 %v2897_v17, %v1483_v40  ;;  %v1543_v49 = vadd.f32 %v2897_v17, %v1499_v41  ;;  %v1381_v50 = vpop.f32.mrb[12].mxu0  ;;  %v1429_v51 = vpop.f32.mrb[12].mxu1 }
 0x2d6   : > { %1558 = vst [vmem:[%s2773_s16 + $0x50] sm:$0xff] %v1526_v44  ;;  %1574 = vst [vmem:[%s2773_s16 + $0xd0] sm:$0xff] %v1542_v45  ;;  %v1484_v52 = vadd.f32 %v1452_v42, %v1381_v50  ;;  %v1500_v53 = vadd.f32 %v1468_v43, %v1429_v51  ;;  %v1383_v54 = vpop.f32.mrb[13].mxu0  ;;  %v1431_v55 = vpop.f32.mrb[13].mxu1 }
 0x2d7   : > { %1559 = vst [vmem:[%s2773_s16 + $0x58] sm:$0xff] %v1527_v48  ;;  %1575 = vst [vmem:[%s2773_s16 + $0xd8] sm:$0xff] %v1543_v49  ;;  %v1485_v56 = vadd.f32 %v1453_v46, %v1383_v54  ;;  %v1501_v57 = vadd.f32 %v1469_v47, %v1431_v55 }
 0x2d8   : > { %v1528_v60 = vadd.f32 %v2895_v12, %v1484_v52  ;;  %v1544_v61 = vadd.f32 %v2895_v12, %v1500_v53 }
 0x2d9   : > { %v1529_v0 = vadd.f32 %v2897_v17, %v1485_v56  ;;  %v1545_v1 = vadd.f32 %v2897_v17, %v1501_v57  ;;  %v1387_v2 = vpop.f32.mrb[14].mxu0  ;;  %v1435_v3 = vpop.f32.mrb[14].mxu1 }
 0x2da   : > { %1560 = vst [vmem:[%s2773_s16 + $0x60] sm:$0xff] %v1528_v60  ;;  %1576 = vst [vmem:[%s2773_s16 + $0xe0] sm:$0xff] %v1544_v61  ;;  %v1486_v4 = vadd.f32 %v1454_v58, %v1387_v2  ;;  %v1502_v5 = vadd.f32 %v1470_v59, %v1435_v3  ;;  %v1389_v6 = vpop.f32.mrb[15].mxu0  ;;  %v1437_v7 = vpop.f32.mrb[15].mxu1 }
 0x2db   : > { %1561 = vst [vmem:[%s2773_s16 + $0x68] sm:$0xff] %v1529_v0  ;;  %1577 = vst [vmem:[%s2773_s16 + $0xe8] sm:$0xff] %v1545_v1  ;;  %v1487_v8 = vadd.f32 %v1455_v62, %v1389_v6  ;;  %v1503_v9 = vadd.f32 %v1471_v63, %v1437_v7 }
 0x2dc   : > { %v1530_v10 = vadd.f32 %v2895_v12, %v1486_v4  ;;  %v1546_v11 = vadd.f32 %v2895_v12, %v1502_v5 }
 0x2dd   : > { %v1531_v13 = vadd.f32 %v2897_v17, %v1487_v8  ;;  %v1547_v14 = vadd.f32 %v2897_v17, %v1503_v9 }
 0x2de   : > { %1562 = vst [vmem:[%s2773_s16 + $0x70] sm:$0xff] %v1530_v10  ;;  %1578 = vst [vmem:[%s2773_s16 + $0xf0] sm:$0xff] %v1546_v11 }
 0x2df   : > { %1563 = vst [vmem:[%s2773_s16 + $0x78] sm:$0xff] %v1531_v13  ;;  %1579 = vst [vmem:[%s2773_s16 + $0xf8] sm:$0xff] %v1547_v14 }
 0x2e0 PF: > { %s3139_s6 = sld [smem:[#allocation17_spill]]  ;;  %s1597_s4 = sshll.u32 %s2773_s16, 4  ;;  %s2966_s4 = int_to_ptr.vmem [resolvable:$true] %s1597_s4 }
 0x2e1   : > { %s3140_s15 = sld [smem:[#allocation32_spill]]  ;;  %s3141_s13 = sand.u32 1, %s2346_s19  }
 0x2e2   : > { %s2975_s24 = scalar_lea.sflag [#allocation6], %s3141_s13  ;;  %s2236_s17 = scalar_lea.vmem %s2966_s4, 4096 }
 0x2e3   : > { %p2237_p2 = scmp.ne.s32.totalorder %s2966_s4, %s2236_s17  ;;  %p3142_p9 = scmp.ne.s32.totalorder %s3119_s27, 0 }
 0x2e4   : > { %s2411_s16 = smov [#allocation9]  }
 0x2e5   : > { %p2238_p0 = pnand %p2237_p2, %p3142_p9 }
 0x2e6   : > { %s1866_s2 = sshll.u32 %s3139_s6, 6 }
 0x2e7   : > { %s1594_s21 = sadd.s32 %s1866_s2, %s2749_s14  ;;  %p2239_p3 = pneg %p2238_p0 }
 0x2e8   : > { %s1861_s12 = sshll.u32 %s1594_s21, 7  ;;  %s2240_s14 = sshll.u32 %s2411_s16, 4  ;;  %s2241_s14 = int_to_ptr.vmem [resolvable:$false] %s2240_s14 }
 0x2e9   : > { %s2971_s28 = scalar_lea.hbm %s3140_s15, %s1861_s12  ;;  %s2242_s10 = scalar_lea.vmem %s2241_s14, 8192 }
 0x2ea   : > { %p2243_p5 = scmp.lt.s32.totalorder %s2966_s4, %s2241_s14  ;;  %p2244_p6 = scmp.lt.s32.totalorder %s2242_s10, %s2236_s17 }
 0x2ec   : > { %p2245_p8 = por %p2244_p6, %p2243_p5 }
 0x2ee   : > { %p2246_p10 = pnand %p2245_p8, %p2239_p3 }
 0x2f0   : > { %2249 = shalt.err (!%p2246_p10)
}
 0x2f1   : > { %s2250_s3 = scalar_lea.hbm %s2971_s28, 4096  ;;  %s2254_s1 = scalar_lea.hbm %s3140_s15, 16384 }
 0x2f2   : > { %p2251_p11 = scmp.ne.s32.totalorder %s2971_s28, %s2250_s3  ;;  %p2255_p12 = scmp.lt.u32.totalorder %s2971_s28, %s3140_s15 }
 0x2f3   : > { %p2256_p13 = scmp.lt.u32.totalorder %s2254_s1, %s2250_s3  ;;  %p2258_p2 = scmp.lt.u32.totalorder %s2250_s3, %s2971_s28 }
 0x2f4   : > { %p2252_p7 = pnand %p2251_p11, %p3142_p9 }
 0x2f5   : > { %p2257_p1 = por %p2256_p13, %p2255_p12 }
 0x2f6   : > { %p2253_p4 = pneg %p2252_p7 }
 0x2f7   : > { %p2259_p0 = por %p2258_p2, %p2257_p1 }
 0x2f9   : > { %p2260_p3 = pnand %p2259_p0, %p2253_p4 }
 0x2fb   : > { %2263 = shalt.err (!%p2260_p3)
}
 0x2fc   : > { %s2412_s30 = smov 256   ;;  %s2413_s6 = smov 512  }
 0x2fd   : > { %s2414_s2 = smov 16  }
 0x2fe   : > { %1937 = dma.vmem_to_hbm [thread:$0]  (%p3142_p9), %s2966_s4, 4096, %s2971_s28, %s2975_s24, %s2412_s30, %s2413_s6, %s2414_s2  }
 0x2ff PF: > { %p1951_p5 = scmp.ge.s32.totalorder %s2402_s8, 2  ;;  %s1612_s21 = sand.u32 1, %s2342_s18  }
 0x300   : > { %p3143_p6 = scmp.ne.s32.totalorder %s3122_s9, 0  ;;  %s1613_s12 = scalar_lea.sflag [#allocation6], %s1612_s21 }
 0x302   : > { %p1947_p8 = pnand %p1951_p5, %p3143_p6 }
 0x304   : > { %2337 = dma.done.wait (!%p1947_p8), %s1613_s12, 4096  }
 0x305   : > { %2339 = vsyncadd (!%p1947_p8), %s1613_s12, 4294963200  ;;  %s24_s8 = sadd.s32 1, %s2402_s8   ;;  %s3145_s27 = sld [smem:[#allocation25_spill]] }
 0x306   : > { %p3004_p10 = scmp.ge.s32.totalorder %s24_s8, 10   ;;  %s3146_s24 = sld [smem:[#allocation13_spill]] }
 0x307   : > { %s3147_s25 = sld [smem:[#allocation14_spill]]  ;;  %s3149_s9 = sld [smem:[#allocation18_spill]] }
 0x308   : > { %s3148_s26 = sld [smem:[#allocation26_spill]]  ;;  %s3150_s28 = sld [smem:[#allocation19_spill]] }
 0x309   : > { %s3151_s29 = sld [smem:[#allocation20_spill]]  ;;  %s3152_s30 = sld [smem:[#allocation21_spill]] }
 0x30a   : > { %s3153_s6 = sld [smem:[#allocation23_spill]]  ;;  %s3154_s7 = sld [smem:[#allocation24_spill]] }
 0x30b   : > { %s3155_s18 = smov %s2346_s19  ;;  %s3156_s19 = smov %s2350_s20 }
 0x30c   : > { %s3157_s20 = smov %s2676_s0  ;;  %s3158_s21 = smov %s2358_s22 }
 0x30d   : > { %s3159_s22 = smov %s2362_s23  ;;  %s3160_s23 = smov %s3145_s27 }
 0x30e   : > { %s3161_s27 = smov %s3149_s9  ;;  %23 = sbr.rel (!%p3004_p10) target bundleno = 20 (0x14), region = 115 }
 0x315   :  { %1618 = vsyncpa [#allocation5], 1 }
 0x316   :  { %1620 = vsyncpa [#allocation5 + $0x1], 1 }
 0x317   :  { %1621 = vsyncpa [#allocation8], 1 }
 0x318   :  { %1623 = vsyncpa [#allocation8 + $0x1], 1 }
 0x319   :  { %1624 = vsyncpa [#allocation6], 1 }
 0x31a   :  { %1626 = vsyncpa [#allocation6 + $0x1], 1 }

</bundles_post_ra>
